<compile_context>
chip_gen: v7x
topology: tpu7x:2x2x1
jax: 0.10.0
libtpu: 0.0.40
codegen_flags: <defaults>
</compile_context>

<pallas_src>
import jax
import jax.numpy as jnp
import numpy as np
from jax.experimental import pallas as pl
from jax.experimental.pallas import tpu as pltpu


def _hashnet_loss_kernel(lhs_ref, w_ref, tot_ref, pos_ref, cnt_ref):
    """One grid step handles a (tile_n,)-wide slab of the train set.

    Accumulates (VPU adds only) into three tiny VMEM-resident output slabs:
      tot: exp_loss          (summed later -> total)
      pos: sim * exp_loss    (summed later -> sp)
      cnt: similarity (0/1)  (summed later -> S1)
    """
    k = pl.program_id(1)

    @pl.when(k == 0)
    def _init():
        tot_ref[...] = jnp.zeros_like(tot_ref)
        pos_ref[...] = jnp.zeros_like(pos_ref)
        cnt_ref[...] = jnp.zeros_like(cnt_ref)

    lhs = lhs_ref[...]          # (2B, K) bf16: [[alpha*tanh(u), 0], [0, y]]
    w = w_ref[...]              # (K, tile_n) bf16 state slab: [[U.T], [Y.T]]

    # One MXU matmul: rows 0..B -> alpha * u @ U.T, rows B..2B -> y @ Y.T.
    prod = jnp.dot(lhs, w, preferred_element_type=jnp.float32)    # (2B, tile_n)
    b = prod.shape[0] // 2
    dot = prod[:b]                                                # (B, tile_n)
    sim = (prod[b:] > 0.0).astype(jnp.float32)   # exact 0/1 (integer counts in f32)

    # exp_loss = log(1 + exp(-|d|)) + clamp(d, min=0) - sim * d
    exp_loss = (jnp.log1p(jnp.exp(-jnp.abs(dot)))
                + jnp.maximum(dot, 0.0) - sim * dot)

    acc_w = tot_ref.shape[-1]
    n_chunks = dot.shape[-1] // acc_w

    def fold(x):
        # (B, tile_n) -> (B, acc_w): lane-tile-aligned chunk adds (pure VPU).
        r = x[:, :acc_w]
        for j in range(1, n_chunks):
            r = r + x[:, j * acc_w:(j + 1) * acc_w]
        return r

    tot_ref[...] += fold(exp_loss)[None]          # -> total
    pos_ref[...] += fold(sim * exp_loss)[None]    # -> sp (sim is exact 0/1)
    cnt_ref[...] += fold(sim)[None]               # -> S1


def _fold_width(tile_n, max_chunks=64):
    """Accumulator lane width: a multiple of 128 dividing tile_n, chosen so the
    unrolled per-step fold stays <= max_chunks chunk adds per accumulated array."""
    if tile_n % 128:
        return tile_n
    c = tile_n // 128
    for d in range(1, c + 1):
        if c % d == 0 and c // d <= max_chunks:
            return 128 * d
    return tile_n


def _choose_tiling(num_train, row_bytes, inter_bytes_per_col, n_split,
                   target_bytes, vmem_budget):
    """Pick (n_split, tile_n): tile_n is a multiple of 128 that divides the
    per-core range, sized so each grid step streams ~target_bytes of state
    (amortizes the ~0.35us/step overhead) while the double-buffered tile plus
    f32 intermediates stay well inside the VMEM budget."""
    per_col = 2 * row_bytes + inter_bytes_per_col
    max_cols = min(target_bytes // row_bytes,
                   int(vmem_budget * 0.75) // max(per_col, 1))
    max_cols = max(128, (max_cols // 128) * 128)
    for split in (n_split, 1):
        if split is None or split < 1 or num_train % split:
            continue
        per = num_train // split
        if per % 128:
            continue
        best, t = None, 128
        lim = min(per, max_cols)
        while t <= lim:
            if per % t == 0:
                best = t
            t += 128
        if best is not None:
            return split, best
    # TODO(synk): pad + mask num_train that is not a multiple of 128 instead of
    # falling back to a single full-width tile (fine for small train sets).
    return 1, num_train


def hashnet_loss(u, y, ind, W_T, *, alpha=0.1, scale=1.0,
                 tile_n=None, n_split=None):
    """HashNetLoss.forward. Returns (loss, W_T_new).

    W_T: (bit + n_class, num_train) fused transposed module state [U.T; Y.T],
    typically bf16 for lane-dense half-bandwidth streaming."""
    B, bit = u.shape
    n_class = y.shape[1]
    K, num_train = W_T.shape
    assert K == bit + n_class, (K, bit, n_class)

    # Glue: tanh + state scatter (must precede the matmuls, as in PyTorch).
    u_t = jnp.tanh(scale * u.astype(jnp.float32))                 # (B, bit)
    y_f = y.astype(jnp.float32)                                   # (B, C)
    W_T_new = W_T.at[:, ind].set(
        jnp.concatenate([u_t, y_f], axis=1).astype(W_T.dtype).T)  # (K, B) columns

    # Block-diagonal LHS so one MXU matmul yields both products; cast once.
    lhs = jnp.concatenate(
        [jnp.concatenate([alpha * u_t, jnp.zeros((B, n_class), jnp.float32)], 1),
         jnp.concatenate([jnp.zeros((B, bit), jnp.float32), y_f], 1)],
        axis=0).astype(W_T.dtype)                                 # (2B, K)

    # Generation-aware step sizing / VMEM budget.
    w_isize = jnp.dtype(W_T.dtype).itemsize
    row_bytes = K * w_isize
    inter_per_col = 10 * B * 4      # rough f32 intermediates per streamed column
    try:
        vmem_cap = int(pltpu.get_tpu_info().vmem_capacity_bytes)
    except Exception:               # defensive fallback -> conservative budget
        vmem_cap = 64 * 1024 * 1024
    if vmem_cap <= 64 * 1024 * 1024:         # v7x-class: 64 MiB VMEM, 2 TCs, 3.2 TB/s
        target_bytes = 12 * 1024 * 1024
        vmem_budget = min(vmem_cap * 3 // 4, 48 * 1024 * 1024)
        default_split = 2
    else:                                    # v5e / v6e-class: 128 MiB VMEM, 1 TC
        target_bytes = 8 * 1024 * 1024
        vmem_budget = 96 * 1024 * 1024
        default_split = 1
    if n_split is None:
        n_split = default_split
    if tile_n is None:
        n_split, tile_n = _choose_tiling(num_train, row_bytes, inter_per_col,
                                         n_split, target_bytes, vmem_budget)
    if num_train % n_split:
        n_split = 1
    per_core = num_train // n_split
    assert per_core % tile_n == 0, (num_train, n_split, tile_n)
    tiles = per_core // tile_n
    acc_w = _fold_width(tile_n)

    # VMEM estimate: double-buffered bf16 state tile + tiny resident
    # accumulators + f32 intermediates for the (2B, tile_n) product/math.
    est = (2 * tile_n * row_bytes
           + 2 * 2 * B * K * w_isize
           + 2 * 3 * B * acc_w * 4
           + inter_per_col * tile_n)
    vmem_limit = int(min(max(2 * est, 32 * 1024 * 1024), vmem_budget))

    acc_shape = jax.ShapeDtypeStruct((n_split, B, acc_w), jnp.float32)
    acc_spec = pl.BlockSpec((1, B, acc_w), lambda c, k: (c, 0, 0))

    acc_tot, acc_pos, acc_cnt = pl.pallas_call(
        _hashnet_loss_kernel,
        out_shape=(acc_shape, acc_shape, acc_shape),
        grid_spec=pltpu.PrefetchScalarGridSpec(
            num_scalar_prefetch=0,
            grid=(n_split, tiles),
            in_specs=[
                pl.BlockSpec((2 * B, K), lambda c, k: (0, 0)),     # block-diag lhs
                # fused [U.T; Y.T] slab; pipeline_mode=pl.Buffered(3) is a
                # further knob to sweep once profiled on hardware.
                pl.BlockSpec((K, tile_n), lambda c, k: (0, c * tiles + k)),
            ],
            out_specs=[acc_spec, acc_spec, acc_spec],
        ),
        compiler_params=pltpu.CompilerParams(
            # Leading "parallel" axis (length = #TensorCores) shards the train
            # range across cores on v7x; on 1-TC chips n_split defaults to 1.
            dimension_semantics=("parallel", "arbitrary"),
            vmem_limit_bytes=vmem_limit),
    )(lhs, W_T_new)

    # Final scalar reductions + combine (sn = total - sp, s0 = B*num_train - s1).
    # NOTE: f32 counts are exact only up to 2^24 pairs; fine for typical sizes.
    total = jnp.sum(acc_tot)
    sp = jnp.sum(acc_pos)
    s1 = jnp.sum(acc_cnt)
    sn = total - sp
    s0 = jnp.float32(B * num_train) - s1
    # loss = (sp*S/S1 + sn*S/S0)/S = sp/S1 + sn/S0, guarded against S1/S0 == 0.
    loss = (jnp.where(s1 > 0, sp / jnp.maximum(s1, 1.0), 0.0)
            + jnp.where(s0 > 0, sn / jnp.maximum(s0, 1.0), 0.0))
    return loss, W_T_new


def reference_loss(u, y, ind, U, Y, alpha, scale):
    """Pure-JAX f32 replica of the PyTorch forward for validation."""
    u_t = jnp.tanh(scale * u)
    U = U.at[ind, :].set(u_t)
    Y = Y.at[ind, :].set(y.astype(jnp.float32))
    sim = (y.astype(jnp.float32) @ Y.T > 0).astype(jnp.float32)
    dot = alpha * u_t @ U.T
    exp_loss = jnp.log1p(jnp.exp(-jnp.abs(dot))) + jnp.maximum(dot, 0.0) - sim * dot
    pos = sim > 0
    S1 = jnp.sum(pos.astype(jnp.float32))
    S0 = jnp.sum((~pos).astype(jnp.float32))
    S = S0 + S1
    exp_loss = jnp.where(pos, exp_loss * (S / S1), exp_loss * (S / S0))
    return jnp.sum(exp_loss) / S


if __name__ == "__main__":
    B, bit, n_class, num_train = 8, 32, 16, 4096
    alpha, scale = 0.1, 1.0

    key = jax.random.PRNGKey(0)
    k_u, k_lbl, k_ind = jax.random.split(key, 3)

    u = jax.random.normal(k_u, (B, bit), dtype=jnp.float32)
    labels = jax.random.randint(k_lbl, (B,), 0, n_class)
    y = jax.nn.one_hot(labels, n_class, dtype=jnp.float32)
    ind = jax.random.permutation(k_ind, num_train)[:B]

    # Module state (self.U, self.Y) zero-initialised as in __init__, stored
    # fused + transposed + bf16 for single-stream, half-bandwidth streaming.
    W0_T = jnp.zeros((bit + n_class, num_train), dtype=jnp.bfloat16)

    # f32 reference mirroring the PyTorch module exactly.
    U0 = jnp.zeros((num_train, bit), dtype=jnp.float32)
    Y0 = jnp.zeros((num_train, n_class), dtype=jnp.float32)
    ref = jax.block_until_ready(reference_loss(u, y, ind, U0, Y0, alpha, scale))

    # 1) auto generation-aware tiling, 2)/3) forced multi-tile / multi-split paths.
    for kwargs in ({}, {"tile_n": 512, "n_split": 2}, {"tile_n": 1024, "n_split": 1}):
        loss, W_T_new = hashnet_loss(u, y, ind, W0_T,
                                     alpha=alpha, scale=scale, **kwargs)
        loss = jax.block_until_ready(loss)
        # bf16 state / bf16 MXU inputs => relaxed tolerance vs the f32 reference.
        assert np.allclose(np.asarray(loss), np.asarray(ref),
                           rtol=1e-2, atol=1e-3), (kwargs, float(loss), float(ref))

    # State update check: scattered columns hold [tanh(scale*u); y].
    np.testing.assert_allclose(
        np.asarray(W_T_new[:bit, ind].T.astype(jnp.float32)),
        np.asarray(jnp.tanh(scale * u)), rtol=1e-2, atol=1e-2)
    np.testing.assert_array_equal(
        np.asarray(W_T_new[bit:, ind].T.astype(jnp.float32)), np.asarray(y))

    print("KERNEL_OK")
</pallas_src>

<mosaic_0001>
module attributes {stable_mosaic.version = 11 : i64} {
  func.func @_hashnet_loss_kernel(%arg0: i32, %arg1: i32, %arg2: memref<16x48xbf16, #tpu.memory_space<vmem>>, %arg3: memref<48x2048xbf16, #tpu.memory_space<vmem>>, %arg4: memref<1x8x128xf32, #tpu.memory_space<vmem>>, %arg5: memref<1x8x128xf32, #tpu.memory_space<vmem>>, %arg6: memref<1x8x128xf32, #tpu.memory_space<vmem>>) attributes {dimension_semantics = [#tpu.dimension_semantics<parallel>, #tpu.dimension_semantics<arbitrary>], iteration_bounds = array<i64: 2, 1>, scalar_prefetch = 0 : i64, scratch_operands = 0 : i64, tpu.core_type = #tpu.core_type<tc>, window_params = [{pipeline_mode = #tpu.pipeline_mode<synchronous>, transform_indices = @transform_0, window_bounds = array<i64: 16, 48>}, {transform_indices = @transform_1, window_bounds = array<i64: 48, 2048>}, {transform_indices = @transform_2, window_bounds = array<i64: 1, 8, 128>}, {transform_indices = @transform_3, window_bounds = array<i64: 1, 8, 128>}, {transform_indices = @transform_4, window_bounds = array<i64: 1, 8, 128>}]} {
    %c0_i32 = arith.constant 0 : i32
    %0 = arith.cmpi eq, %arg1, %c0_i32 : i32
    %1 = arith.extui %0 : i1 to i32
    %c0_i32_0 = arith.constant 0 : i32
    %2 = arith.cmpi ne, %1, %c0_i32_0 : i32
    scf.if %2 {
      %cst_25 = arith.constant 0.000000e+00 : f32
      %128 = vector.broadcast %cst_25 : f32 to vector<1x8x128xf32>
      %c0_26 = arith.constant 0 : index
      %c0_27 = arith.constant 0 : index
      %c0_28 = arith.constant 0 : index
      %129 = vector.load %arg4[%c0_26, %c0_27, %c0_28] : memref<1x8x128xf32, #tpu.memory_space<vmem>>, vector<1x8x128xf32>
      tpu.vector_store %arg4[%c0_26, %c0_27, %c0_28], %128 {strides = array<i32>} : memref<1x8x128xf32, #tpu.memory_space<vmem>>, vector<1x8x128xf32>,
      %cst_29 = arith.constant 0.000000e+00 : f32
      %130 = vector.broadcast %cst_29 : f32 to vector<1x8x128xf32>
      %c0_30 = arith.constant 0 : index
      %c0_31 = arith.constant 0 : index
      %c0_32 = arith.constant 0 : index
      %131 = vector.load %arg5[%c0_30, %c0_31, %c0_32] : memref<1x8x128xf32, #tpu.memory_space<vmem>>, vector<1x8x128xf32>
      tpu.vector_store %arg5[%c0_30, %c0_31, %c0_32], %130 {strides = array<i32>} : memref<1x8x128xf32, #tpu.memory_space<vmem>>, vector<1x8x128xf32>,
      %cst_33 = arith.constant 0.000000e+00 : f32
      %132 = vector.broadcast %cst_33 : f32 to vector<1x8x128xf32>
      %c0_34 = arith.constant 0 : index
      %c0_35 = arith.constant 0 : index
      %c0_36 = arith.constant 0 : index
      %133 = vector.load %arg6[%c0_34, %c0_35, %c0_36] : memref<1x8x128xf32, #tpu.memory_space<vmem>>, vector<1x8x128xf32>
      tpu.vector_store %arg6[%c0_34, %c0_35, %c0_36], %132 {strides = array<i32>} : memref<1x8x128xf32, #tpu.memory_space<vmem>>, vector<1x8x128xf32>,
    } else {
    }
    %c0 = arith.constant 0 : index
    %c0_1 = arith.constant 0 : index
    %3 = vector.load %arg2[%c0, %c0_1] : memref<16x48xbf16, #tpu.memory_space<vmem>>, vector<16x48xbf16>
    %c0_2 = arith.constant 0 : index
    %c0_3 = arith.constant 0 : index
    %4 = vector.load %arg3[%c0_2, %c0_3] : memref<48x2048xbf16, #tpu.memory_space<vmem>>, vector<48x2048xbf16>
    %cst = arith.constant dense<0.000000e+00> : vector<16x2048xf32>
    %5 = tpu.matmul %3, %4, %cst {dimension_numbers = #tpu.dot_dimension_numbers<[1], [0], [0], [1], [0, 0, 1, 1], [], []>} : vector<16x48xbf16>, vector<48x2048xbf16>, vector<16x2048xf32> -> vector<16x2048xf32>
    %6 = vector.extract_strided_slice %5 {offsets = [0, 0], sizes = [8, 2048], strides = [1, 1]} : vector<16x2048xf32> to vector<8x2048xf32>
    %7 = vector.extract_strided_slice %5 {offsets = [8, 0], sizes = [8, 2048], strides = [1, 1]} : vector<16x2048xf32> to vector<8x2048xf32>
    %cst_4 = arith.constant 0.000000e+00 : f32
    %8 = vector.broadcast %cst_4 : f32 to vector<8x2048xf32>
    %9 = arith.cmpf ogt, %7, %8 : vector<8x2048xf32>
    %10 = arith.extui %9 : vector<8x2048xi1> to vector<8x2048xi32>
    %11 = arith.sitofp %10 : vector<8x2048xi32> to vector<8x2048xf32>
    %12 = math.absf %6 : vector<8x2048xf32>
    %cst_5 = arith.constant 0.000000e+00 : f32
    %13 = vector.broadcast %cst_5 : f32 to vector<8x2048xf32>
    %14 = arith.subf %13, %12 : vector<8x2048xf32>
    %15 = math.exp %14 : vector<8x2048xf32>
    %16 = math.log1p %15 : vector<8x2048xf32>
    %cst_6 = arith.constant 0.000000e+00 : f32
    %17 = vector.broadcast %cst_6 : f32 to vector<8x2048xf32>
    %18 = arith.maximumf %6, %17 : vector<8x2048xf32>
    %19 = arith.addf %16, %18 : vector<8x2048xf32>
    %20 = arith.mulf %11, %6 : vector<8x2048xf32>
    %21 = arith.subf %19, %20 : vector<8x2048xf32>
    %c0_7 = arith.constant 0 : index
    %c0_8 = arith.constant 0 : index
    %c0_9 = arith.constant 0 : index
    %22 = vector.load %arg4[%c0_7, %c0_8, %c0_9] : memref<1x8x128xf32, #tpu.memory_space<vmem>>, vector<1x8x128xf32>
    %23 = vector.extract_strided_slice %21 {offsets = [0, 0], sizes = [8, 128], strides = [1, 1]} : vector<8x2048xf32> to vector<8x128xf32>
    %24 = vector.extract_strided_slice %21 {offsets = [0, 128], sizes = [8, 128], strides = [1, 1]} : vector<8x2048xf32> to vector<8x128xf32>
    %25 = arith.addf %23, %24 : vector<8x128xf32>
    %26 = vector.extract_strided_slice %21 {offsets = [0, 256], sizes = [8, 128], strides = [1, 1]} : vector<8x2048xf32> to vector<8x128xf32>
    %27 = arith.addf %25, %26 : vector<8x128xf32>
    %28 = vector.extract_strided_slice %21 {offsets = [0, 384], sizes = [8, 128], strides = [1, 1]} : vector<8x2048xf32> to vector<8x128xf32>
    %29 = arith.addf %27, %28 : vector<8x128xf32>
    %30 = vector.extract_strided_slice %21 {offsets = [0, 512], sizes = [8, 128], strides = [1, 1]} : vector<8x2048xf32> to vector<8x128xf32>
    %31 = arith.addf %29, %30 : vector<8x128xf32>
    %32 = vector.extract_strided_slice %21 {offsets = [0, 640], sizes = [8, 128], strides = [1, 1]} : vector<8x2048xf32> to vector<8x128xf32>
    %33 = arith.addf %31, %32 : vector<8x128xf32>
    %34 = vector.extract_strided_slice %21 {offsets = [0, 768], sizes = [8, 128], strides = [1, 1]} : vector<8x2048xf32> to vector<8x128xf32>
    %35 = arith.addf %33, %34 : vector<8x128xf32>
    %36 = vector.extract_strided_slice %21 {offsets = [0, 896], sizes = [8, 128], strides = [1, 1]} : vector<8x2048xf32> to vector<8x128xf32>
    %37 = arith.addf %35, %36 : vector<8x128xf32>
    %38 = vector.extract_strided_slice %21 {offsets = [0, 1024], sizes = [8, 128], strides = [1, 1]} : vector<8x2048xf32> to vector<8x128xf32>
    %39 = arith.addf %37, %38 : vector<8x128xf32>
    %40 = vector.extract_strided_slice %21 {offsets = [0, 1152], sizes = [8, 128], strides = [1, 1]} : vector<8x2048xf32> to vector<8x128xf32>
    %41 = arith.addf %39, %40 : vector<8x128xf32>
    %42 = vector.extract_strided_slice %21 {offsets = [0, 1280], sizes = [8, 128], strides = [1, 1]} : vector<8x2048xf32> to vector<8x128xf32>
    %43 = arith.addf %41, %42 : vector<8x128xf32>
    %44 = vector.extract_strided_slice %21 {offsets = [0, 1408], sizes = [8, 128], strides = [1, 1]} : vector<8x2048xf32> to vector<8x128xf32>
    %45 = arith.addf %43, %44 : vector<8x128xf32>
    %46 = vector.extract_strided_slice %21 {offsets = [0, 1536], sizes = [8, 128], strides = [1, 1]} : vector<8x2048xf32> to vector<8x128xf32>
    %47 = arith.addf %45, %46 : vector<8x128xf32>
    %48 = vector.extract_strided_slice %21 {offsets = [0, 1664], sizes = [8, 128], strides = [1, 1]} : vector<8x2048xf32> to vector<8x128xf32>
    %49 = arith.addf %47, %48 : vector<8x128xf32>
    %50 = vector.extract_strided_slice %21 {offsets = [0, 1792], sizes = [8, 128], strides = [1, 1]} : vector<8x2048xf32> to vector<8x128xf32>
    %51 = arith.addf %49, %50 : vector<8x128xf32>
    %52 = vector.extract_strided_slice %21 {offsets = [0, 1920], sizes = [8, 128], strides = [1, 1]} : vector<8x2048xf32> to vector<8x128xf32>
    %53 = arith.addf %51, %52 : vector<8x128xf32>
    %54 = vector.shape_cast %53 : vector<8x128xf32> to vector<1x8x128xf32>
    %55 = arith.addf %22, %54 : vector<1x8x128xf32>
    %c0_10 = arith.constant 0 : index
    %c0_11 = arith.constant 0 : index
    %c0_12 = arith.constant 0 : index
    %56 = vector.load %arg4[%c0_10, %c0_11, %c0_12] : memref<1x8x128xf32, #tpu.memory_space<vmem>>, vector<1x8x128xf32>
    tpu.vector_store %arg4[%c0_10, %c0_11, %c0_12], %55 {strides = array<i32>} : memref<1x8x128xf32, #tpu.memory_space<vmem>>, vector<1x8x128xf32>,
    %c0_13 = arith.constant 0 : index
    %c0_14 = arith.constant 0 : index
    %c0_15 = arith.constant 0 : index
    %57 = vector.load %arg5[%c0_13, %c0_14, %c0_15] : memref<1x8x128xf32, #tpu.memory_space<vmem>>, vector<1x8x128xf32>
    %58 = arith.mulf %11, %21 : vector<8x2048xf32>
    %59 = vector.extract_strided_slice %58 {offsets = [0, 0], sizes = [8, 128], strides = [1, 1]} : vector<8x2048xf32> to vector<8x128xf32>
    %60 = vector.extract_strided_slice %58 {offsets = [0, 128], sizes = [8, 128], strides = [1, 1]} : vector<8x2048xf32> to vector<8x128xf32>
    %61 = arith.addf %59, %60 : vector<8x128xf32>
    %62 = vector.extract_strided_slice %58 {offsets = [0, 256], sizes = [8, 128], strides = [1, 1]} : vector<8x2048xf32> to vector<8x128xf32>
    %63 = arith.addf %61, %62 : vector<8x128xf32>
    %64 = vector.extract_strided_slice %58 {offsets = [0, 384], sizes = [8, 128], strides = [1, 1]} : vector<8x2048xf32> to vector<8x128xf32>
    %65 = arith.addf %63, %64 : vector<8x128xf32>
    %66 = vector.extract_strided_slice %58 {offsets = [0, 512], sizes = [8, 128], strides = [1, 1]} : vector<8x2048xf32> to vector<8x128xf32>
    %67 = arith.addf %65, %66 : vector<8x128xf32>
    %68 = vector.extract_strided_slice %58 {offsets = [0, 640], sizes = [8, 128], strides = [1, 1]} : vector<8x2048xf32> to vector<8x128xf32>
    %69 = arith.addf %67, %68 : vector<8x128xf32>
    %70 = vector.extract_strided_slice %58 {offsets = [0, 768], sizes = [8, 128], strides = [1, 1]} : vector<8x2048xf32> to vector<8x128xf32>
    %71 = arith.addf %69, %70 : vector<8x128xf32>
    %72 = vector.extract_strided_slice %58 {offsets = [0, 896], sizes = [8, 128], strides = [1, 1]} : vector<8x2048xf32> to vector<8x128xf32>
    %73 = arith.addf %71, %72 : vector<8x128xf32>
    %74 = vector.extract_strided_slice %58 {offsets = [0, 1024], sizes = [8, 128], strides = [1, 1]} : vector<8x2048xf32> to vector<8x128xf32>
    %75 = arith.addf %73, %74 : vector<8x128xf32>
    %76 = vector.extract_strided_slice %58 {offsets = [0, 1152], sizes = [8, 128], strides = [1, 1]} : vector<8x2048xf32> to vector<8x128xf32>
    %77 = arith.addf %75, %76 : vector<8x128xf32>
    %78 = vector.extract_strided_slice %58 {offsets = [0, 1280], sizes = [8, 128], strides = [1, 1]} : vector<8x2048xf32> to vector<8x128xf32>
    %79 = arith.addf %77, %78 : vector<8x128xf32>
    %80 = vector.extract_strided_slice %58 {offsets = [0, 1408], sizes = [8, 128], strides = [1, 1]} : vector<8x2048xf32> to vector<8x128xf32>
    %81 = arith.addf %79, %80 : vector<8x128xf32>
    %82 = vector.extract_strided_slice %58 {offsets = [0, 1536], sizes = [8, 128], strides = [1, 1]} : vector<8x2048xf32> to vector<8x128xf32>
    %83 = arith.addf %81, %82 : vector<8x128xf32>
    %84 = vector.extract_strided_slice %58 {offsets = [0, 1664], sizes = [8, 128], strides = [1, 1]} : vector<8x2048xf32> to vector<8x128xf32>
    %85 = arith.addf %83, %84 : vector<8x128xf32>
    %86 = vector.extract_strided_slice %58 {offsets = [0, 1792], sizes = [8, 128], strides = [1, 1]} : vector<8x2048xf32> to vector<8x128xf32>
    %87 = arith.addf %85, %86 : vector<8x128xf32>
    %88 = vector.extract_strided_slice %58 {offsets = [0, 1920], sizes = [8, 128], strides = [1, 1]} : vector<8x2048xf32> to vector<8x128xf32>
    %89 = arith.addf %87, %88 : vector<8x128xf32>
    %90 = vector.shape_cast %89 : vector<8x128xf32> to vector<1x8x128xf32>
    %91 = arith.addf %57, %90 : vector<1x8x128xf32>
    %c0_16 = arith.constant 0 : index
    %c0_17 = arith.constant 0 : index
    %c0_18 = arith.constant 0 : index
    %92 = vector.load %arg5[%c0_16, %c0_17, %c0_18] : memref<1x8x128xf32, #tpu.memory_space<vmem>>, vector<1x8x128xf32>
    tpu.vector_store %arg5[%c0_16, %c0_17, %c0_18], %91 {strides = array<i32>} : memref<1x8x128xf32, #tpu.memory_space<vmem>>, vector<1x8x128xf32>,
    %c0_19 = arith.constant 0 : index
    %c0_20 = arith.constant 0 : index
    %c0_21 = arith.constant 0 : index
    %93 = vector.load %arg6[%c0_19, %c0_20, %c0_21] : memref<1x8x128xf32, #tpu.memory_space<vmem>>, vector<1x8x128xf32>
    %94 = vector.extract_strided_slice %11 {offsets = [0, 0], sizes = [8, 128], strides = [1, 1]} : vector<8x2048xf32> to vector<8x128xf32>
    %95 = vector.extract_strided_slice %11 {offsets = [0, 128], sizes = [8, 128], strides = [1, 1]} : vector<8x2048xf32> to vector<8x128xf32>
    %96 = arith.addf %94, %95 : vector<8x128xf32>
    %97 = vector.extract_strided_slice %11 {offsets = [0, 256], sizes = [8, 128], strides = [1, 1]} : vector<8x2048xf32> to vector<8x128xf32>
    %98 = arith.addf %96, %97 : vector<8x128xf32>
    %99 = vector.extract_strided_slice %11 {offsets = [0, 384], sizes = [8, 128], strides = [1, 1]} : vector<8x2048xf32> to vector<8x128xf32>
    %100 = arith.addf %98, %99 : vector<8x128xf32>
    %101 = vector.extract_strided_slice %11 {offsets = [0, 512], sizes = [8, 128], strides = [1, 1]} : vector<8x2048xf32> to vector<8x128xf32>
    %102 = arith.addf %100, %101 : vector<8x128xf32>
    %103 = vector.extract_strided_slice %11 {offsets = [0, 640], sizes = [8, 128], strides = [1, 1]} : vector<8x2048xf32> to vector<8x128xf32>
    %104 = arith.addf %102, %103 : vector<8x128xf32>
    %105 = vector.extract_strided_slice %11 {offsets = [0, 768], sizes = [8, 128], strides = [1, 1]} : vector<8x2048xf32> to vector<8x128xf32>
    %106 = arith.addf %104, %105 : vector<8x128xf32>
    %107 = vector.extract_strided_slice %11 {offsets = [0, 896], sizes = [8, 128], strides = [1, 1]} : vector<8x2048xf32> to vector<8x128xf32>
    %108 = arith.addf %106, %107 : vector<8x128xf32>
    %109 = vector.extract_strided_slice %11 {offsets = [0, 1024], sizes = [8, 128], strides = [1, 1]} : vector<8x2048xf32> to vector<8x128xf32>
    %110 = arith.addf %108, %109 : vector<8x128xf32>
    %111 = vector.extract_strided_slice %11 {offsets = [0, 1152], sizes = [8, 128], strides = [1, 1]} : vector<8x2048xf32> to vector<8x128xf32>
    %112 = arith.addf %110, %111 : vector<8x128xf32>
    %113 = vector.extract_strided_slice %11 {offsets = [0, 1280], sizes = [8, 128], strides = [1, 1]} : vector<8x2048xf32> to vector<8x128xf32>
    %114 = arith.addf %112, %113 : vector<8x128xf32>
    %115 = vector.extract_strided_slice %11 {offsets = [0, 1408], sizes = [8, 128], strides = [1, 1]} : vector<8x2048xf32> to vector<8x128xf32>
    %116 = arith.addf %114, %115 : vector<8x128xf32>
    %117 = vector.extract_strided_slice %11 {offsets = [0, 1536], sizes = [8, 128], strides = [1, 1]} : vector<8x2048xf32> to vector<8x128xf32>
    %118 = arith.addf %116, %117 : vector<8x128xf32>
    %119 = vector.extract_strided_slice %11 {offsets = [0, 1664], sizes = [8, 128], strides = [1, 1]} : vector<8x2048xf32> to vector<8x128xf32>
    %120 = arith.addf %118, %119 : vector<8x128xf32>
    %121 = vector.extract_strided_slice %11 {offsets = [0, 1792], sizes = [8, 128], strides = [1, 1]} : vector<8x2048xf32> to vector<8x128xf32>
    %122 = arith.addf %120, %121 : vector<8x128xf32>
    %123 = vector.extract_strided_slice %11 {offsets = [0, 1920], sizes = [8, 128], strides = [1, 1]} : vector<8x2048xf32> to vector<8x128xf32>
    %124 = arith.addf %122, %123 : vector<8x128xf32>
    %125 = vector.shape_cast %124 : vector<8x128xf32> to vector<1x8x128xf32>
    %126 = arith.addf %93, %125 : vector<1x8x128xf32>
    %c0_22 = arith.constant 0 : index
    %c0_23 = arith.constant 0 : index
    %c0_24 = arith.constant 0 : index
    %127 = vector.load %arg6[%c0_22, %c0_23, %c0_24] : memref<1x8x128xf32, #tpu.memory_space<vmem>>, vector<1x8x128xf32>
    tpu.vector_store %arg6[%c0_22, %c0_23, %c0_24], %126 {strides = array<i32>} : memref<1x8x128xf32, #tpu.memory_space<vmem>>, vector<1x8x128xf32>,
    return
  }
  func.func @transform_0(%arg0: i32, %arg1: i32) -> (i32, i32) {
    %c0_i32 = arith.constant 0 : i32
    %c0_i32_0 = arith.constant 0 : i32
    %c0_i32_1 = arith.constant 0 : i32
    return %c0_i32, %c0_i32_0 : i32, i32
  }
  func.func @transform_1(%arg0: i32, %arg1: i32) -> (i32, i32) {
    %c1_i32 = arith.constant 1 : i32
    %0 = arith.muli %arg0, %c1_i32 : i32
    %1 = arith.addi %0, %arg1 : i32
    %c0_i32 = arith.constant 0 : i32
    %c0_i32_0 = arith.constant 0 : i32
    return %c0_i32, %1 : i32, i32
  }
  func.func @transform_2(%arg0: i32, %arg1: i32) -> (i32, i32, i32) {
    %c0_i32 = arith.constant 0 : i32
    %c0_i32_0 = arith.constant 0 : i32
    %c0_i32_1 = arith.constant 0 : i32
    return %arg0, %c0_i32, %c0_i32_0 : i32, i32, i32
  }
  func.func @transform_3(%arg0: i32, %arg1: i32) -> (i32, i32, i32) {
    %c0_i32 = arith.constant 0 : i32
    %c0_i32_0 = arith.constant 0 : i32
    %c0_i32_1 = arith.constant 0 : i32
    return %arg0, %c0_i32, %c0_i32_0 : i32, i32, i32
  }
  func.func @transform_4(%arg0: i32, %arg1: i32) -> (i32, i32, i32) {
    %c0_i32 = arith.constant 0 : i32
    %c0_i32_0 = arith.constant 0 : i32
    %c0_i32_1 = arith.constant 0 : i32
    return %arg0, %c0_i32, %c0_i32_0 : i32, i32, i32
  }
}

</mosaic_0001>

<bundles_post_ra>
// kernel: tpu_custom_call.1
= control target key start
LH: loop header
LB: loop body
LE: loop exit
PB: predicated region body
PF: predicated region fallthrough
CT: control target
= control target key end

     0   :  { %s2747_s0 = inlined_call_operand.hbm [shape: bf16[16,48], index: 0, kind: input, shape index: {}]   ;;  %s2748_s1 = inlined_call_operand.hbm [shape: bf16[48,4096], index: 1, kind: input, shape index: {}]   ;;  %s2749_s2 = inlined_call_operand.hbm [shape: f32[2,8,128], index: 2, kind: output, shape index: {0}]   ;;  %s2750_s3 = inlined_call_operand.hbm [shape: f32[2,8,128], index: 3, kind: output, shape index: {1}]   ;;  %s2751_s4 = inlined_call_operand.hbm [shape: f32[2,8,128], index: 4, kind: output, shape index: {2}]  }
   0x1   :  { %2762 = sst [smem:[#allocation15_spill]] %s2747_s0 }
   0x2   :  { %10 = vsyncpa [#allocation3], 0 }
   0x3   :  { %11 = vsyncpa [#allocation6], 0 }
   0x4   :  { %13 = vsyncpa [#allocation6 + $0x1], 0 }
   0x5   :  { %14 = vsyncpa [#allocation4], 0 }
   0x6   :  { %16 = vsyncpa [#allocation4 + $0x1], 0 }
   0x7   :  { %17 = vsyncpa [#allocation9], 0 }
   0x8   :  { %19 = vsyncpa [#allocation9 + $0x1], 0  ;;  %s2001_s15 = smov 0   ;;  %s2003_s16 = smov 0  }
   0x9   :  { %s2005_s17 = smov 0   ;;  %s2007_s18 = smov 0  }
   0xa   :  { %s2009_s19 = smov 0   ;;  %s2011_s20 = smov 0  }
   0xb LB: > { %s2032_s21 = sadd.s32 4294967295, %s1963_s20   ;;  %s2757_s22 = sadd.s32 4294967294, %s1963_s20   ;;  %s1963_s20 = sphi %s2011_s20, %s25_s20   ;;  %s1959_s19 = sphi %s2009_s19, %s2809_s19   ;;  %s1955_s18 = sphi %s2007_s18, %s2808_s18   ;;  %s1951_s17 = sphi %s2005_s17, %s2807_s17   ;;  %s1947_s16 = sphi %s2003_s16, %s2806_s16   ;;  %s1943_s15 = sphi %s2001_s15, %s2805_s15  }
   0xc   : > { %p74_p0 = scmp.ne.s32.totalorder %s1951_s17, %s1947_s16  ;;  %p75_p1 = scmp.eq.s32.totalorder %s1963_s20, 0 }
   0xd   : > { %p80_p2 = scmp.ne.s32.totalorder %s1947_s16, %s1943_s15  ;;  %p2752_p3 = scmp.eq.s32.totalorder %s2032_s21, 0 }
   0xe   : > { %p2041_p4 = por %p75_p1, %p74_p0  ;;  %p104_p5 = scmp.eq.s32.totalorder %s2032_s21, 1 }
   0xf   : > { %p2048_p6 = por %p2752_p3, %p80_p2  ;;  %p110_p7 = scmp.eq.s32.totalorder %s2757_s22, 1 }
  0x10   : > { %p2054_p8 = por %p104_p5, %p74_p0  ;;  %p1511_p9 = scmp.ge.s32.totalorder %s1963_s20, 1 }
  0x11   : > { %s2764_s24 = scalar_select %p2048_p6, 1, 0 }
  0x12   : > { %s2765_s25 = scalar_select %p2054_p8, 1, 0 }
  0x13   : > { %p2059_p10 = por %p110_p7, %p80_p2  ;;  %p169_p11 = scmp.lt.s32.totalorder %s1963_s20, 3 }
  0x14   : > { %s1965_s28 = smov [#allocation2]   ;;  %p1636_p1 = scmp.lt.s32.totalorder %s1963_s20, 2 }
  0x15   : > { %s2766_s26 = scalar_select %p2059_p10, 1, 0 }
  0x16   : > { %p2064_p12 = pnand %p1511_p9, %p169_p11  ;;  %s181_s29 = sshll.u32 %s1965_s28, 4  ;;  %s2068_s29 = int_to_ptr.vmem [resolvable:$true] %s181_s29 }
  0x17   : > { %p2082_p2 = pnand %p1636_p1, %p2041_p4  ;;  %s37_s6 = sadd.s32 1, %s1959_s19 }
  0x18   : > { %s2767_s27 = scalar_select %p2064_p12, 1, 0 }
  0x19   : > { %p1617_p13 = pneg %p2064_p12  ;;  %s2770_s0 = sld [smem:[#allocation15_spill]] }
  0x1a   : > { %s2769_s5 = scalar_select %p2082_p2, 1, 0 }
  0x1b   : > { %p2076_p5 = pnand %p1617_p13, %p2752_p3 }
  0x1d   : > { %p1761_p9 = pneg %p2076_p5 }
  0x1f   : > { %s1759_s9 = scalar_lea.hbm %s2770_s0, 128 }
  0x20   : > { %p1760_p7 = scmp.ne.s32.totalorder %s2770_s0, %s1759_s9  ;;  %p1766_p4 = scmp.lt.u32.totalorder %s1759_s9, %s2770_s0 }
  0x22   : > { %p1762_p11 = pnand %p1761_p9, %p1760_p7 }
  0x24   : > { %p1763_p13 = pneg %p1762_p11 }
  0x26   : > { %p1768_p1 = pnand %p1766_p4, %p1763_p13 }
  0x28   : > { %1771 = shalt.err (!%p1768_p1)
}
  0x29   : > { %s1772_s14 = scalar_lea.vmem %s2068_s29, 128  ;;  %p1780_p8 = scmp.lt.s32.totalorder %s2068_s29, %s2068_s29 }
  0x2a   : > { %p1773_p0 = scmp.ne.s32.totalorder %s2068_s29, %s1772_s14  ;;  %p1781_p6 = scmp.lt.s32.totalorder %s1772_s14, %s1772_s14 }
  0x2c   : > { %p1775_p3 = pnand %p1773_p0, %p1761_p9  ;;  %p1782_p12 = por %p1781_p6, %p1780_p8 }
  0x2e   : > { %p1776_p10 = pneg %p1775_p3 }
  0x30   : > { %p1783_p2 = pnand %p1782_p12, %p1776_p10 }
  0x32   : > { %1786 = shalt.err (!%p1783_p2)
}
  0x33   : > { %s2758_s23 = smov 64   ;;  %s1967_s28 = smov 4  }
  0x34   : > { %1620 = dma.hbm_to_vmem [thread:$0]  (!%p2076_p5), %s2770_s0, 128, %s2068_s29, [#allocation3], %s2758_s23, %s2758_s23, %s1967_s28  }
  0x35   : > { %p39_p3 = scmp.ge.s32.totalorder %s37_s6, 2  ;;  %s67_s9 = sadd.s32 1, %s1951_s17 }
  0x36   : > { %s195_s10 = sand.u32 1, %s1951_s17   ;;  %s1602_s13 = sshll.u32 %s1959_s19, 10 }
  0x37   : > { %s2811_s6 = smov (%p39_p3, %s37_s6), 0  ;;  %s1603_s11 = smul.u32 384, %s195_s10 }
  0x38   : > { %s64_s12 = ssub.s32 %s1959_s19, %s2811_s6  ;;  %s2120_s22 = scalar_lea.hbm %s2748_s1, %s1602_s13 }
  0x39   : > { %p65_p6 = scmp.eq.s32.totalorder %s64_s12, 0  ;;  %s199_s29 = scalar_lea.vmem [#allocation5], %s1603_s11 }
  0x3a   : > { %s207_s28 = sshll.u32 %s199_s29, 4  ;;  %s2127_s8 = scalar_lea.sflag [#allocation6], %s195_s10  ;;  %s2125_s28 = int_to_ptr.vmem [resolvable:$true] %s207_s28 }
  0x3b   : > { %s2123_s7 = scalar_select %p65_p6, %s1951_s17, %s67_s9  }
  0x3c   : > { %s1787_s23 = scalar_lea.hbm %s2120_s22, 6144  ;;  %p2771_p10 = scmp.ne.s32.totalorder %s2769_s5, 0 }
  0x3d   : > { %p1788_p8 = scmp.ne.s32.totalorder %s2120_s22, %s1787_s23  ;;  %s1792_s14 = scalar_lea.hbm %s2748_s1, 12288 }
  0x3e   : > { %p1789_p12 = pneg %p2771_p10  ;;  %p1793_p2 = scmp.lt.u32.totalorder %s2120_s22, %s2748_s1 }
  0x3f   : > { %p1794_p7 = scmp.lt.u32.totalorder %s1792_s14, %s1787_s23  ;;  %p1796_p11 = scmp.lt.u32.totalorder %s1787_s23, %s2120_s22 }
  0x40   : > { %p1790_p0 = pnand %p1789_p12, %p1788_p8 }
  0x41   : > { %p1795_p9 = por %p1794_p7, %p1793_p2 }
  0x42   : > { %p1791_p5 = pneg %p1790_p0 }
  0x43   : > { %p1797_p13 = por %p1796_p11, %p1795_p9 }
  0x45   : > { %p1798_p4 = pnand %p1797_p13, %p1791_p5 }
  0x47   : > { %1801 = shalt.err (!%p1798_p4)
}
  0x48   : > { %s1802_s9 = scalar_lea.vmem %s2125_s28, 6144  ;;  %s1968_s10 = smov [#allocation5]  }
  0x49   : > { %p1803_p1 = scmp.ne.s32.totalorder %s2125_s28, %s1802_s9  ;;  %s1807_s29 = sshll.u32 %s1968_s10, 4  ;;  %s1808_s29 = int_to_ptr.vmem [resolvable:$false] %s1807_s29 }
  0x4a   : > { %s1809_s12 = scalar_lea.vmem %s1808_s29, 12288  ;;  %p1810_p8 = scmp.lt.s32.totalorder %s2125_s28, %s1808_s29 }
  0x4b   : > { %p1805_p3 = pnand %p1803_p1, %p1789_p12  ;;  %p1811_p0 = scmp.lt.s32.totalorder %s1809_s12, %s1802_s9 }
  0x4d   : > { %p1806_p6 = pneg %p1805_p3  ;;  %p1812_p2 = por %p1811_p0, %p1810_p8 }
  0x4f   : > { %p1813_p7 = pnand %p1812_p2, %p1806_p6 }
  0x51   : > { %1816 = shalt.err (!%p1813_p7)
}
  0x52   : > { %s1969_s23 = smov 2048   ;;  %s1970_s13 = smov 1024  }
  0x53   : > { %s2772_s14 = smov 64   ;;  %p2773_p12 = scmp.ne.s32.totalorder %s2767_s27, 0 }
  0x54   : > { %1624 = dma.hbm_to_vmem [thread:$0]  (!%p2771_p10), %s2120_s22, 6144, %s2125_s28, %s2127_s8, %s1969_s23, %s1970_s13, %s2772_s14  }
  0x55   : > { %219 = sbr.rel (%p2773_p12) target bundleno = 494 (0x1ee), region = 28  ;;  %p2774_p5 = scmp.eq.s32.totalorder (!%p2773_p12), %s2032_s21, 0 }
  0x5c   : > { %1926 = dma.done.wait (%p2774_p5), [#allocation3], 128   ;;  %p2775_p9 = pmov %p2774_p5 }
  0x5d   : > { %s2163_s11 = sand.u32 1, %s1947_s16   ;;  %p2776_p10 = scmp.ne.s32.totalorder %s2764_s24, 0 }
  0x5e   : > { %1928 = vsyncadd (%p2775_p9), [#allocation3], 4294967168  ;;  %s1604_s30 = smul.u32 384, %s2163_s11  ;;  %s226_s9 = scalar_lea.sflag [#allocation6], %s2163_s11 }
  0x60   : > { %s2167_s5 = scalar_lea.vmem [#allocation5], %s1604_s30 }
  0x61   : > { %1930 = dma.done.wait (%p2776_p10), %s226_s9, 6144  }
  0x62   : > { %1932 = vsyncadd (%p2776_p10), %s226_s9, 4294961152  ;;  %v1971_v0 = vmov 0   ;;  %v276_v1 = vld [vmem:[%s2167_s5] sm:$0xff]  ;;  %v277_v3 = vld [vmem:[%s2167_s5 + $0x8] sm:$0xff]  ;;  %vm569_vm0 = vcmask 392192   ;;  %s2603_s22 = sshll.u32 %s2163_s11, 3 }
  0x63   : > { %605 = vmatprep.mubr.bf16.mxu0 %v1971_v0  ;;  %648 = vmatprep.mubr.bf16.mxu1 %v1971_v0  ;;  %v284_v2 = vld [vmem:[%s2167_s5 + $0x40] sm:$0xff]  ;;  %v285_v5 = vld [vmem:[%s2167_s5 + $0x48] sm:$0xff]  ;;  %v278_v23 = vld [vmem:[%s2167_s5 + $0x10] sm:$0xff]  ;;  %s263_s24 = scalar_lea.vmem [#allocation10], %s2603_s22  ;;  %s1597_s28 = sshll.u32 %s1955_s18, 7 }
  0x64   : > { %v1523_v4 = vcombine.high %v276_v1, %v284_v2  ;;  %v1522_v6 = vcombine.low %v276_v1, %v284_v2  ;;  %v292_v7 = vld [vmem:[%s2167_s5 + $0x80] sm:$0xff]  ;;  %v1525_v9 = vcombine.high %v277_v3, %v285_v5  ;;  %v1524_v10 = vcombine.low %v277_v3, %v285_v5  ;;  %v293_v12 = vld [vmem:[%s2167_s5 + $0x88] sm:$0xff]  ;;  %v286_v24 = vld [vmem:[%s2167_s5 + $0x50] sm:$0xff]  ;;  %s249_s8 = scalar_lea.vmem [#allocation7], %s2603_s22  ;;  %s2761_s29 = scalar_lea.vmem [#allocation8], %s2603_s22 }
  0x65   : > { %v300_v8 = vld [vmem:[%s2167_s5 + $0xc0] sm:$0xff]  ;;  %v301_v13 = vld [vmem:[%s2167_s5 + $0xc8] sm:$0xff]  ;;  %v279_v25 = vld [vmem:[%s2167_s5 + $0x18] sm:$0xff]  ;;  %v1527_v29 = vcombine.high %v278_v23, %v286_v24  ;;  %v1526_v36 = vcombine.low %v278_v23, %v286_v24  ;;  %s1331_s10 = sshll.u32 %s249_s8, 4  ;;  %s1344_s12 = sshll.u32 %s2761_s29, 4  ;;  %s2634_s10 = int_to_ptr.vmem [resolvable:$true] %s1331_s10  ;;  %s2641_s12 = int_to_ptr.vmem [resolvable:$true] %s1344_s12 }
  0x66   : > { %v1539_v11 = vcombine.high %v292_v7, %v300_v8  ;;  %v308_v14 = vld [vmem:[%s2167_s5 + $0x100] sm:$0xff]  ;;  %573 = vmatprep.subr.bf16.mxu0 %v1523_v4  ;;  %v1541_v15 = vcombine.high %v293_v12, %v301_v13  ;;  %v309_v17 = vld [vmem:[%s2167_s5 + $0x108] sm:$0xff]  ;;  %616 = vmatprep.subr.bf16.mxu1 %v1525_v9  ;;  %v1538_v19 = vcombine.low %v292_v7, %v300_v8  ;;  %v287_v26 = vld [vmem:[%s2167_s5 + $0x58] sm:$0xff]  ;;  %s1357_s23 = sshll.u32 %s263_s24, 4  ;;  %s2632_s30 = scalar_lea.hbm %s2749_s2, %s1597_s28  ;;  %s2648_s23 = int_to_ptr.vmem [resolvable:$true] %s1357_s23 }
  0x67   : > { %v316_v16 = vld [vmem:[%s2167_s5 + $0x140] sm:$0xff]  ;;  %v317_v18 = vld [vmem:[%s2167_s5 + $0x148] sm:$0xff]  ;;  %574 = vmatpush1.bf16.msra.mxu0 %v1522_v6  ;;  %617 = vmatpush1.bf16.msra.mxu1 %v1524_v10  ;;  %v1540_v20 = vcombine.low %v293_v12, %v301_v13  ;;  %v1529_v30 = vcombine.high %v279_v25, %v287_v26  ;;  %v294_v31 = vld [vmem:[%s2167_s5 + $0x90] sm:$0xff]  ;;  %v1528_v37 = vcombine.low %v279_v25, %v287_v26  ;;  %s2646_s29 = scalar_lea.hbm %s2751_s4, %s1597_s28  ;;  %s1308_s13 = scalar_lea.sflag [#allocation4], %s2163_s11 }
  0x68   : > { %575 = vmatprep.subr.bf16.mxu0 %v1539_v11  ;;  %v1555_v21 = vcombine.high %v308_v14, %v316_v16  ;;  %618 = vmatprep.subr.bf16.mxu1 %v1541_v15  ;;  %v1557_v22 = vcombine.high %v309_v17, %v317_v18  ;;  %v1554_v27 = vcombine.low %v308_v14, %v316_v16  ;;  %v302_v32 = vld [vmem:[%s2167_s5 + $0xd0] sm:$0xff]  ;;  %v2193_v33 = vld [vmem:[#allocation2] sm:$0xff]   ;;  %v280_v48 = vld [vmem:[%s2167_s5 + $0x20] sm:$0xff]  ;;  %s1817_s14 = scalar_lea.vmem %s2634_s10, 128  ;;  %p2799_p13 = scmp.ne.s32.totalorder %s2765_s25, 0 }
  0x69   : > { %v1556_v28 = vcombine.low %v309_v17, %v317_v18  ;;  %v295_v34 = vld [vmem:[%s2167_s5 + $0x98] sm:$0xff]  ;;  %v1543_v38 = vcombine.high %v294_v31, %v302_v32  ;;  %v310_v40 = vld [vmem:[%s2167_s5 + $0x110] sm:$0xff]  ;;  %v1542_v44 = vcombine.low %v294_v31, %v302_v32  ;;  %v288_v49 = vld [vmem:[%s2167_s5 + $0x60] sm:$0xff]  ;;  %p1818_p11 = scmp.ne.s32.totalorder %s2634_s10, %s1817_s14  ;;  %s1973_s18 = smov [#allocation7]  }
  0x6a   : > { %v303_v35 = vld [vmem:[%s2167_s5 + $0xd8] sm:$0xff]  ;;  %v318_v41 = vld [vmem:[%s2167_s5 + $0x150] sm:$0xff]  ;;  %v281_v50 = vld [vmem:[%s2167_s5 + $0x28] sm:$0xff]  ;;  %v1531_v54 = vcombine.high %v280_v48, %v288_v49  ;;  %v1530_v60 = vcombine.low %v280_v48, %v288_v49  ;;  %s1821_s9 = sshll.u32 %s1973_s18, 4  ;;  %s1822_s9 = int_to_ptr.vmem [resolvable:$false] %s1821_s9 }
  0x6b   : > { %576 = vmatpush1.bf16.msra.mxu0 %v1538_v19  ;;  %619 = vmatpush1.bf16.msra.mxu1 %v1540_v20  ;;  %v1545_v39 = vcombine.high %v295_v34, %v303_v35  ;;  %v311_v42 = vld [vmem:[%s2167_s5 + $0x118] sm:$0xff]  ;;  %v1544_v45 = vcombine.low %v295_v34, %v303_v35  ;;  %v1559_v46 = vcombine.high %v310_v40, %v318_v41  ;;  %v289_v51 = vld [vmem:[%s2167_s5 + $0x68] sm:$0xff]  ;;  %v296_v56 = vld [vmem:[%s2167_s5 + $0xa0] sm:$0xff]  ;;  %p1819_p4 = pnand %p1818_p11, %p2799_p13  ;;  %s1823_s0 = scalar_lea.vmem %s1822_s9, 256 }
  0x6c   : > { %577 = vmatprep.subr.bf16.mxu0 %v1555_v21  ;;  %620 = vmatprep.subr.bf16.mxu1 %v1557_v22  ;;  %v319_v43 = vld [vmem:[%s2167_s5 + $0x158] sm:$0xff]  ;;  %v1558_v52 = vcombine.low %v310_v40, %v318_v41  ;;  %v1533_v55 = vcombine.high %v281_v50, %v289_v51  ;;  %v304_v57 = vld [vmem:[%s2167_s5 + $0xe0] sm:$0xff]  ;;  %v297_v58 = vld [vmem:[%s2167_s5 + $0xa8] sm:$0xff]  ;;  %v1532_v61 = vcombine.low %v281_v50, %v289_v51  ;;  %p1824_p3 = scmp.lt.s32.totalorder %s2634_s10, %s1822_s9  ;;  %p1825_p6 = scmp.lt.s32.totalorder %s1823_s0, %s1817_s14 }
  0x6d   : > { %v1561_v47 = vcombine.high %v311_v42, %v319_v43  ;;  %v1560_v53 = vcombine.low %v311_v42, %v319_v43  ;;  %v305_v59 = vld [vmem:[%s2167_s5 + $0xe8] sm:$0xff]  ;;  %v1547_v62 = vcombine.high %v296_v56, %v304_v57  ;;  %v312_v1 = vld [vmem:[%s2167_s5 + $0x120] sm:$0xff]  ;;  %v1546_v5 = vcombine.low %v296_v56, %v304_v57  ;;  %v282_v9 = vld [vmem:[%s2167_s5 + $0x30] sm:$0xff]  ;;  %p1820_p1 = pneg %p1819_p4 }
  0x6e   : > { %v1549_v63 = vcombine.high %v297_v58, %v305_v59  ;;  %v320_v2 = vld [vmem:[%s2167_s5 + $0x160] sm:$0xff]  ;;  %v313_v3 = vld [vmem:[%s2167_s5 + $0x128] sm:$0xff]  ;;  %v1548_v6 = vcombine.low %v297_v58, %v305_v59  ;;  %v290_v10 = vld [vmem:[%s2167_s5 + $0x70] sm:$0xff]  ;;  %p1826_p8 = por %p1825_p6, %p1824_p3 }
  0x6f   : > { %578 = vmatpush1.bf16.msra.mxu0 %v1554_v27  ;;  %621 = vmatpush1.bf16.msra.mxu1 %v1556_v28  ;;  %v321_v4 = vld [vmem:[%s2167_s5 + $0x168] sm:$0xff]  ;;  %v1563_v7 = vcombine.high %v312_v1, %v320_v2  ;;  %v283_v11 = vld [vmem:[%s2167_s5 + $0x38] sm:$0xff]  ;;  %v1562_v13 = vcombine.low %v312_v1, %v320_v2  ;;  %v1535_v15 = vcombine.high %v282_v9, %v290_v10  ;;  %v298_v17 = vld [vmem:[%s2167_s5 + $0xb0] sm:$0xff] }
  0x70   : > { %659 = vmatprep.subr.bf16.mxu0 %v1527_v29  ;;  %702 = vmatprep.subr.bf16.mxu1 %v1529_v30  ;;  %v1565_v8 = vcombine.high %v313_v3, %v321_v4  ;;  %v291_v12 = vld [vmem:[%s2167_s5 + $0x78] sm:$0xff]  ;;  %v1564_v14 = vcombine.low %v313_v3, %v321_v4  ;;  %v306_v18 = vld [vmem:[%s2167_s5 + $0xf0] sm:$0xff]  ;;  %v1534_v21 = vcombine.low %v282_v9, %v290_v10  ;;  %p1827_p0 = pnand %p1826_p8, %p1820_p1 }
  0x71   : > { %v1537_v16 = vcombine.high %v283_v11, %v291_v12  ;;  %v299_v19 = vld [vmem:[%s2167_s5 + $0xb8] sm:$0xff]  ;;  %v1536_v22 = vcombine.low %v283_v11, %v291_v12  ;;  %v1551_v23 = vcombine.high %v298_v17, %v306_v18  ;;  %v314_v25 = vld [vmem:[%s2167_s5 + $0x130] sm:$0xff]  ;;  %v1550_v29 = vcombine.low %v298_v17, %v306_v18 }
  0x72   : > { %1570 = vmatmul.mubr.msk.bf16.vlgmr.msra.gmra.mrb[0].mxu0 %vm569_vm0, %v2193_v33  ;;  %1571 = vmatmul.mubr.msk.bf16.vlgmr.msra.gmra.mrb[0].mxu1 %vm569_vm0, %v2193_v33  ;;  %v307_v20 = vld [vmem:[%s2167_s5 + $0xf8] sm:$0xff]  ;;  %v322_v26 = vld [vmem:[%s2167_s5 + $0x170] sm:$0xff] }
  0x73   : > { %660 = vmatpush1.bf16.msra.mxu0 %v1526_v36  ;;  %703 = vmatpush1.bf16.msra.mxu1 %v1528_v37  ;;  %v1553_v24 = vcombine.high %v299_v19, %v307_v20  ;;  %v315_v27 = vld [vmem:[%s2167_s5 + $0x138] sm:$0xff]  ;;  %v1552_v30 = vcombine.low %v299_v19, %v307_v20  ;;  %v1567_v31 = vcombine.high %v314_v25, %v322_v26 }
  0x74   : > { %661 = vmatprep.subr.bf16.mxu0 %v1543_v38  ;;  %704 = vmatprep.subr.bf16.mxu1 %v1545_v39  ;;  %v323_v28 = vld [vmem:[%s2167_s5 + $0x178] sm:$0xff]  ;;  %v1566_v34 = vcombine.low %v314_v25, %v322_v26  ;;  %s2639_s5 = scalar_lea.hbm %s2750_s3, %s1597_s28 }
  0x75   : > { %691 = vmatprep.mubr.bf16.mxu0 %v1971_v0  ;;  %734 = vmatprep.mubr.bf16.mxu1 %v1971_v0  ;;  %v1569_v32 = vcombine.high %v315_v27, %v323_v28  ;;  %v1568_v35 = vcombine.low %v315_v27, %v323_v28 }
  0x77   : > { %662 = vmatpush1.bf16.msra.mxu0 %v1542_v44  ;;  %705 = vmatpush1.bf16.msra.mxu1 %v1544_v45 }
  0x78   : > { %663 = vmatprep.subr.bf16.mxu0 %v1559_v46  ;;  %706 = vmatprep.subr.bf16.mxu1 %v1561_v47 }
  0x7b   : > { %664 = vmatpush1.bf16.msra.mxu0 %v1558_v52  ;;  %707 = vmatpush1.bf16.msra.mxu1 %v1560_v53  ;;  %v2759_v53 = vmov 0.0  }
  0x7c   : > { %745 = vmatprep.subr.bf16.mxu0 %v1531_v54  ;;  %788 = vmatprep.subr.bf16.mxu1 %v1533_v55 }
  0x7e   : > { %1572 = vmatmul.mubr.msk.bf16.vlgmr.msra.gmra.mrb[4].mxu0 %vm569_vm0, %v2193_v33  ;;  %1573 = vmatmul.mubr.msk.bf16.vlgmr.msra.gmra.mrb[4].mxu1 %vm569_vm0, %v2193_v33 }
  0x7f   : > { %746 = vmatpush1.bf16.msra.mxu0 %v1530_v60  ;;  %789 = vmatpush1.bf16.msra.mxu1 %v1532_v61 }
  0x80   : > { %747 = vmatprep.subr.bf16.mxu0 %v1547_v62  ;;  %790 = vmatprep.subr.bf16.mxu1 %v1549_v63 }
  0x81   : > { %777 = vmatprep.mubr.bf16.mxu0 %v1971_v0  ;;  %820 = vmatprep.mubr.bf16.mxu1 %v1971_v0 }
  0x83   : > { %748 = vmatpush1.bf16.msra.mxu0 %v1546_v5  ;;  %791 = vmatpush1.bf16.msra.mxu1 %v1548_v6 }
  0x84   : > { %749 = vmatprep.subr.bf16.mxu0 %v1563_v7  ;;  %792 = vmatprep.subr.bf16.mxu1 %v1565_v8 }
  0x87   : > { %750 = vmatpush1.bf16.msra.mxu0 %v1562_v13  ;;  %793 = vmatpush1.bf16.msra.mxu1 %v1564_v14 }
  0x88   : > { %831 = vmatprep.subr.bf16.mxu0 %v1535_v15  ;;  %874 = vmatprep.subr.bf16.mxu1 %v1537_v16 }
  0x8a   : > { %1574 = vmatmul.mubr.msk.bf16.vlgmr.msra.gmra.mrb[8].mxu0 %vm569_vm0, %v2193_v33  ;;  %1575 = vmatmul.mubr.msk.bf16.vlgmr.msra.gmra.mrb[8].mxu1 %vm569_vm0, %v2193_v33 }
  0x8b   : > { %832 = vmatpush1.bf16.msra.mxu0 %v1534_v21  ;;  %875 = vmatpush1.bf16.msra.mxu1 %v1536_v22 }
  0x8c   : > { %833 = vmatprep.subr.bf16.mxu0 %v1551_v23  ;;  %876 = vmatprep.subr.bf16.mxu1 %v1553_v24 }
  0x8d   : > { %863 = vmatprep.mubr.bf16.mxu0 %v1971_v0  ;;  %906 = vmatprep.mubr.bf16.mxu1 %v1971_v0 }
  0x8f   : > { %834 = vmatpush1.bf16.msra.mxu0 %v1550_v29  ;;  %877 = vmatpush1.bf16.msra.mxu1 %v1552_v30 }
  0x90   : > { %835 = vmatprep.subr.bf16.mxu0 %v1567_v31  ;;  %878 = vmatprep.subr.bf16.mxu1 %v1569_v32 }
  0x93   : > { %836 = vmatpush1.bf16.msra.mxu0 %v1566_v34  ;;  %879 = vmatpush1.bf16.msra.mxu1 %v1568_v35 }
  0x96   : > { %1576 = vmatmul.mubr.msk.bf16.vlgmr.msra.gmra.mrb[12].mxu0 %vm569_vm0, %v2193_v33  ;;  %1577 = vmatmul.mubr.msk.bf16.vlgmr.msra.gmra.mrb[12].mxu1 %vm569_vm0, %v2193_v33 }
 0x145   : > { %v2247_v36 = vpop.f32.mrb[0].mxu0  ;;  %v2250_v38 = vpop.f32.mrb[0].mxu1 }
 0x146   : > { %v965_v37 = vand.u32 2147483647, %v2247_v36  ;;  %v2252_v0 = vpop.f32.mrb[1].mxu0  ;;  %v967_v39 = vand.u32 2147483647, %v2250_v38  ;;  %v2256_v42 = vpop.f32.mrb[1].mxu1 }
 0x147   : > { %v966_v40 = vand.u32 2147483647, %v2252_v0  ;;  %v611_v43 = vpop.f32.mrb[2].mxu0  ;;  %v968_v33 = vand.u32 2147483647, %v2256_v42  ;;  %v654_v46 = vpop.f32.mrb[2].mxu1 }
 0x148   : > { %v981_v41 = vsub.f32 0.0, %v965_v37  ;;  %v983_v44 = vsub.f32 0.0, %v967_v39  ;;  %vm917_vm1 = vcmp.gt.f32.partialorder %v611_v43, 0.0  ;;  %vm919_vm2 = vcmp.gt.f32.partialorder %v654_v46, 0.0  ;;  %v613_v48 = vpop.f32.mrb[3].mxu0  ;;  %v656_v49 = vpop.f32.mrb[3].mxu1 }
 0x149   : > { %v982_v45 = vsub.f32 0.0, %v966_v40  ;;  %v984_v52 = vsub.f32 0.0, %v968_v33  ;;  %v2260_v54 = vsel %vm917_vm1, 1.0, %v2759_v53  ;;  %v2267_v56 = vsel %vm919_vm2, 1.0, %v2759_v53 }
 0x14a   : > { %v997_v47 = vmul.f32 1.442695, %v981_v41  ;;  %v1001_v50 = vmul.f32 1.442695, %v983_v44  ;;  %v2264_v55 = vmul.f32 %v2260_v54, %v2247_v36  ;;  %vm918_vm3 = vcmp.gt.f32.partialorder %v613_v48, 0.0 }
 0x14b   : > { %v999_v51 = vmul.f32 1.442695, %v982_v45  ;;  %v1003_v57 = vmul.f32 1.442695, %v984_v52  ;;  %v2271_v58 = vmul.f32 %v2267_v56, %v2250_v38  ;;  %v2274_v59 = vsel %vm918_vm3, 1.0, %v2759_v53 }
 0x14c   : > { %1695 = vpow2.f32 %v997_v47  ;;  %v2278_v60 = vmul.f32 %v2274_v59, %v2252_v0  ;;  %v1290_v61 = vadd.f32 %v2274_v59, %v2260_v54  ;;  %vm920_vm4 = vcmp.gt.f32.partialorder %v656_v49, 0.0 }
 0x14d   : > { %1697 = vpow2.f32 %v1001_v50  ;;  %v2283_v62 = vsel %vm920_vm4, 1.0, %v2759_v53  ;;  %v1173_v12 = vmax.f32 %v2247_v36, 0.0  ;;  %v1175_v13 = vmax.f32 %v2250_v38, 0.0 }
 0x14e   : > { %1699 = vpow2.f32 %v999_v51  ;;  %v2287_v63 = vmul.f32 %v2283_v62, %v2256_v42  ;;  %v1291_v1 = vadd.f32 %v2267_v56, %v1290_v61  ;;  %v1174_v14 = vmax.f32 %v2252_v0, 0.0 }
 0x14f   : > { %1701 = vpow2.f32 %v1003_v57  ;;  %v1176_v18 = vmax.f32 %v2256_v42, 0.0 }
 0x150   : > { %v2293_v3 = vadd.f32 %v2283_v62, %v1291_v1 }
 0x151   : > { %v2290_v2 = vpop.f32.mrb[4].mxu0  ;;  %v2296_v5 = vpop.f32.mrb[4].mxu1 }
 0x152   : > { %v969_v4 = vand.u32 2147483647, %v2290_v2  ;;  %v2298_v6 = vpop.f32.mrb[5].mxu0  ;;  %v971_v7 = vand.u32 2147483647, %v2296_v5  ;;  %v2302_v10 = vpop.f32.mrb[5].mxu1 }
 0x153   : > { %v970_v8 = vand.u32 2147483647, %v2298_v6  ;;  %v697_v11 = vpop.f32.mrb[6].mxu0  ;;  %v740_v16 = vpop.f32.mrb[6].mxu1  ;;  %v1177_v20 = vmax.f32 %v2290_v2, 0.0 }
 0x154   : > { %v985_v9 = vsub.f32 0.0, %v969_v4  ;;  %v987_v15 = vsub.f32 0.0, %v971_v7  ;;  %v2309_v21 = vpop.f32.mrb[7].mxu0  ;;  %v2311_v22 = vpop.f32.mrb[7].mxu1  ;;  %v972_v31 = vand.u32 2147483647, %v2302_v10 }
 0x155   : > { %v986_v27 = vsub.f32 0.0, %v970_v8  ;;  %vm921_vm5 = vcmp.gt.f32.partialorder %v697_v11, 0.0  ;;  %vm923_vm6 = vcmp.gt.f32.partialorder %v740_v16, 0.0  ;;  %vm922_vm9 = vcmp.gt.f32.partialorder %v2309_v21, 0.0 }
 0x156   : > { %v1696_v17 = vpop.eup %1695  ;;  %v1005_v19 = vmul.f32 1.442695, %v985_v9  ;;  %v1009_v37 = vmul.f32 1.442695, %v987_v15  ;;  %v988_v50 = vsub.f32 0.0, %v972_v31  ;;  %v2338_v9 = vsel %vm921_vm5, 1.0, %v2759_v53 }
 0x157   : > { %v1698_v23 = vpop.eup %1697  ;;  %v1029_v24 = vadd.f32 1.0, %v1696_v17  ;;  %v1032_v25 = vmul.f32 -0.5, %v1696_v17  ;;  %v1035_v34 = vand.u32 2147483647, %v1696_v17  ;;  %v1007_v49 = vmul.f32 1.442695, %v986_v27 }
 0x158   : > { %v1700_v28 = vpop.eup %1699  ;;  %v1047_v29 = vadd.f32 1.0, %v1698_v23  ;;  %v1050_v30 = vmul.f32 -0.5, %v1698_v23  ;;  %1703 = vpow2.f32 %v1005_v19  ;;  %v1053_v40 = vand.u32 2147483647, %v1698_v23 }
 0x159   : > { %v2315_v32 = vpop.eup %1701  ;;  %1705 = vlog2.f32 %v1029_v24  ;;  %v1038_v35 = vadd.f32 1.0, %v1700_v28  ;;  %v1033_v39 = vadd.f32 1.0, %v1032_v25  ;;  %v1041_v41 = vmul.f32 -0.5, %v1700_v28 }
 0x15a   : > { %1707 = vlog2.f32 %v1047_v29  ;;  %v1056_v43 = vadd.f32 1.0, %v2315_v32  ;;  %v1051_v33 = vadd.f32 1.0, %v1050_v30  ;;  %v1059_v46 = vmul.f32 -0.5, %v2315_v32 }
 0x15b   : > { %1709 = vlog2.f32 %v1038_v35  ;;  %vm2321_vm7 = vcmp.lt.f32.partialorder %v1035_v34, 0.0004427343  ;;  %v1044_v48 = vand.u32 2147483647, %v1700_v28  ;;  %v1034_v52 = vmul.f32 %v1696_v17, %v1033_v39 }
 0x15c   : > { %1711 = vlog2.f32 %v1056_v43  ;;  %vm2327_vm8 = vcmp.lt.f32.partialorder %v1053_v40, 0.0004427343  ;;  %v1042_v61 = vadd.f32 1.0, %v1041_v41  ;;  %v1062_v1 = vand.u32 2147483647, %v2315_v32 }
 0x15d   : > { %v2325_v51 = vpop.f32.mrb[8].mxu0  ;;  %1713 = vpow2.f32 %v1009_v37  ;;  %v2332_v4 = vpop.f32.mrb[8].mxu1  ;;  %v1011_v8 = vmul.f32 1.442695, %v988_v50  ;;  %v2342_v15 = vsel %vm923_vm6, 1.0, %v2759_v53  ;;  %v1060_v24 = vadd.f32 1.0, %v1059_v46 }
 0x15e   : > { %v2334_v7 = vpop.f32.mrb[9].mxu0  ;;  %1715 = vpow2.f32 %v1007_v49  ;;  %v2344_v17 = vpop.f32.mrb[9].mxu1  ;;  %v2350_v25 = vmul.f32 %v2338_v9, %v2290_v2  ;;  %v1293_v27 = vadd.f32 %v2338_v9, %v2293_v3  ;;  %v2356_v11 = vmul.f32 %v2342_v15, %v2296_v5 }
 0x15f   : > { %v2346_v19 = vpop.f32.mrb[10].mxu0  ;;  %v2358_v29 = vpop.f32.mrb[10].mxu1  ;;  %1717 = vpow2.f32 %v1011_v8  ;;  %vm924_vm10 = vcmp.gt.f32.partialorder %v2311_v22, 0.0  ;;  %v973_v30 = vand.u32 2147483647, %v2325_v51  ;;  %v1052_v3 = vmul.f32 %v1698_v23, %v1051_v33 }
 0x160   : > { %v2360_v16 = vpop.f32.mrb[11].mxu0  ;;  %v2365_v31 = vpop.f32.mrb[11].mxu1  ;;  %vm2369_vm11 = vcmp.lt.f32.partialorder %v1044_v48, 0.0004427343  ;;  %v2374_v37 = vsel %vm922_vm9, 1.0, %v2759_v53  ;;  %v2377_v39 = vsel %vm924_vm10, 1.0, %v2759_v53  ;;  %v1043_v40 = vmul.f32 %v1700_v28, %v1042_v61 }
 0x161   : > { %v2383_v43 = vmul.f32 %v2374_v37, %v2298_v6  ;;  %vm2385_vm12 = vcmp.lt.f32.partialorder %v1062_v1, 0.0004427343  ;;  %v1294_v48 = vadd.f32 %v2374_v37, %v1293_v27  ;;  %v2392_v49 = vmul.f32 %v2377_v39, %v2302_v10 }
 0x162   : > { %v2367_v34 = vpop.eup %1703  ;;  %v1061_v61 = vmul.f32 %v2315_v32, %v1060_v24  ;;  %v989_v8 = vsub.f32 0.0, %v973_v30  ;;  %v975_v44 = vand.u32 2147483647, %v2332_v4  ;;  %vm925_vm0 = vcmp.gt.f32.partialorder %v2346_v19, 0.0 }
 0x163   : > { %v1706_v21 = vpop.eup %1705  ;;  %v1065_v22 = vadd.f32 1.0, %v2367_v34  ;;  %v1068_v41 = vmul.f32 -0.5, %v2367_v34  ;;  %v1295_v1 = vadd.f32 %v2342_v15, %v1294_v48  ;;  %v1071_v32 = vand.u32 2147483647, %v2367_v34 }
 0x164   : > { %v1708_v23 = vpop.eup %1707  ;;  %v1031_v33 = vmul.f32 0.6931472, %v1706_v21  ;;  %v1013_v57 = vmul.f32 1.442695, %v989_v8  ;;  %vm927_vm1 = vcmp.gt.f32.partialorder %v2358_v29, 0.0  ;;  %vm926_vm2 = vcmp.gt.f32.partialorder %v2360_v16, 0.0 }
 0x165   : > { %v1710_v28 = vpop.eup %1709  ;;  %v1049_v50 = vmul.f32 0.6931472, %v1708_v23  ;;  %1719 = vlog2.f32 %v1065_v22  ;;  %v1069_v23 = vadd.f32 1.0, %v1068_v41  ;;  %v2409_v22 = vadd.f32 %v2377_v39, %v1295_v1 }
 0x166   : > { %v1037_v45 = vsel %vm2321_vm7, %v1034_v52, %v1031_v33  ;;  %v1040_v21 = vmul.f32 0.6931472, %v1710_v28  ;;  %v1712_v26 = vpop.eup %1711  ;;  %vm1072_vm13 = vcmp.lt.f32.partialorder %v1071_v32, 0.0004427343  ;;  %v974_v32 = vand.u32 2147483647, %v2334_v7 }
 0x167   : > { %v1189_v27 = vadd.f32 %v1173_v12, %v1037_v45  ;;  %v1055_v53 = vsel %vm2327_vm8, %v1052_v3, %v1049_v50  ;;  %v1714_v24 = vpop.eup %1713  ;;  %v1058_v30 = vmul.f32 0.6931472, %v1712_v26  ;;  %v991_v50 = vsub.f32 0.0, %v975_v44 }
 0x168   : > { %v1191_v47 = vadd.f32 %v1175_v13, %v1055_v53  ;;  %v1046_v52 = vsel %vm2369_vm11, %v1043_v40, %v1040_v21  ;;  %v1716_v33 = vpop.eup %1715  ;;  %v1083_v45 = vadd.f32 1.0, %v1714_v24  ;;  %v1086_v13 = vmul.f32 -0.5, %v1714_v24 }
 0x169   : > { %v1190_v36 = vadd.f32 %v1174_v14, %v1046_v52  ;;  %v1221_v12 = vsub.f32 %v1189_v27, %v2264_v55  ;;  %v2414_v3 = vpop.f32.mrb[12].mxu0  ;;  %v1064_v38 = vsel %vm2385_vm12, %v1061_v61, %v1058_v30  ;;  %v1074_v26 = vadd.f32 1.0, %v1716_v33  ;;  %v2419_v35 = vpop.f32.mrb[12].mxu1 }
 0x16a   : > { %v1223_v53 = vsub.f32 %v1191_v47, %v2271_v58  ;;  %v2421_v40 = vpop.f32.mrb[13].mxu0  ;;  %v2423_v41 = vpop.eup %1717  ;;  %v1192_v0 = vadd.f32 %v1176_v18, %v1064_v38  ;;  %1721 = vlog2.f32 %v1083_v45  ;;  %v1089_v28 = vand.u32 2147483647, %v1714_v24 }
 0x16b   : > { %v1256_v55 = vmul.f32 %v2260_v54, %v1221_v12  ;;  %v1222_v14 = vsub.f32 %v1190_v36, %v2278_v60  ;;  %v2429_v46 = vpop.f32.mrb[13].mxu1  ;;  %v2431_v48 = vpop.f32.mrb[14].mxu0  ;;  %1723 = vlog2.f32 %v1074_v26  ;;  %v1077_v60 = vmul.f32 -0.5, %v1716_v33 }
 0x16c   : > { %v1258_v58 = vmul.f32 %v2267_v56, %v1223_v53  ;;  %v2434_v61 = vpop.f32.mrb[14].mxu1  ;;  %v2436_v8 = vpop.f32.mrb[15].mxu0  ;;  %v1224_v54 = vsub.f32 %v1192_v0, %v2287_v63  ;;  %v1087_v1 = vadd.f32 1.0, %v1086_v13  ;;  %v1080_v27 = vand.u32 2147483647, %v1716_v33 }
 0x16d   : > { %v1238_v42 = vadd.f32 %v1222_v14, %v1221_v12  ;;  %v1257_v18 = vmul.f32 %v2274_v59, %v1222_v14  ;;  %v2440_v21 = vpop.f32.mrb[15].mxu1  ;;  %v1092_v47 = vadd.f32 1.0, %v2423_v41  ;;  %v1095_v56 = vmul.f32 -0.5, %v2423_v41 }
 0x16e   : > { %v1259_v36 = vmul.f32 %v2283_v62, %v1224_v54  ;;  %v1078_v45 = vadd.f32 1.0, %v1077_v60  ;;  %v1070_v59 = vmul.f32 %v2367_v34, %v1069_v23  ;;  %vm2446_vm14 = vcmp.lt.f32.partialorder %v1089_v28, 0.0004427343 }
 0x16f   : > { %v1720_v52 = vpop.eup %1719  ;;  %v1272_v44 = vadd.f32 %v1257_v18, %v1256_v55  ;;  %v1239_v30 = vadd.f32 %v1238_v42, %v1223_v53  ;;  %1725 = vlog2.f32 %v1092_v47  ;;  %v1096_v26 = vadd.f32 1.0, %v1095_v56 }
 0x170   : > { %v1067_v12 = vmul.f32 0.6931472, %v1720_v52  ;;  %v1088_v14 = vmul.f32 %v1714_v24, %v1087_v1  ;;  %1727 = vpow2.f32 %v1013_v57  ;;  %v1017_v55 = vmul.f32 1.442695, %v991_v50 }
 0x171   : > { %v1240_v63 = vadd.f32 %v1239_v30, %v1224_v54  ;;  %v1273_v38 = vadd.f32 %v1272_v44, %v1258_v58  ;;  %v1079_v42 = vmul.f32 %v1716_v33, %v1078_v45  ;;  %vm2452_vm15 = vcmp.lt.f32.partialorder %v1080_v27, 0.0004427343 }
 0x172   : > { %v1073_v0 = vsel %vm1072_vm13, %v1070_v59, %v1067_v12  ;;  %v1098_v23 = vand.u32 2147483647, %v2423_v41  ;;  %1729 = vpow2.f32 %v1017_v55  ;;  %v976_v58 = vand.u32 2147483647, %v2344_v17 }
 0x173   : > { %v1274_v53 = vadd.f32 %v1273_v38, %v1259_v36  ;;  %v1193_v62 = vadd.f32 %v1177_v20, %v1073_v0  ;;  %v1097_v24 = vmul.f32 %v2423_v41, %v1096_v26  ;;  %v990_v33 = vsub.f32 0.0, %v974_v32 }
 0x174   : > { %v1722_v28 = vpop.eup %1721  ;;  %v992_v50 = vsub.f32 0.0, %v976_v58  ;;  %v2789_v18 = vmov 0.0   ;;  %v2790_v52 = vmax.f32 %v2296_v5, 0.0  ;;  %v2791_v12 = vmax.f32 %v2298_v6, 0.0 }
 0x175   : > { %v1225_v57 = vsub.f32 %v1193_v62, %v2350_v25  ;;  %v1724_v2 = vpop.eup %1723  ;;  %v1085_v20 = vmul.f32 0.6931472, %v1722_v28  ;;  %v2464_v54 = vsel %vm925_vm0, 1.0, %v2789_v18  ;;  %v1015_v25 = vmul.f32 1.442695, %v990_v33 }
 0x176   : > { %v1076_v60 = vmul.f32 0.6931472, %v1724_v2  ;;  %v2469_v41 = vmul.f32 %v2464_v54, %v2325_v51  ;;  %v1019_v47 = vmul.f32 1.442695, %v992_v50  ;;  %v1297_v56 = vadd.f32 %v2464_v54, %v2409_v22 }
 0x177   : > { %v1241_v1 = vadd.f32 %v1240_v63, %v1225_v57  ;;  %v1260_v27 = vmul.f32 %v2338_v9, %v1225_v57  ;;  %v1091_v19 = vsel %vm2446_vm14, %v1088_v14, %v1085_v20  ;;  %v2482_v9 = vsel %vm927_vm1, 1.0, %v2789_v18 }
 0x178   : > { %v1195_v44 = vadd.f32 %v2790_v52, %v1091_v19  ;;  %v1082_v30 = vsel %vm2452_vm15, %v1079_v42, %v1076_v60  ;;  %1731 = vpow2.f32 %v1015_v25  ;;  %v2488_v22 = vmul.f32 %v2482_v9, %v2332_v4 }
 0x179   : > { %v1275_v36 = vadd.f32 %v1274_v53, %v1260_v27  ;;  %v1726_v45 = vpop.eup %1725  ;;  %v1194_v59 = vadd.f32 %v2791_v12, %v1082_v30  ;;  %1733 = vpow2.f32 %v1019_v47  ;;  %v2493_v38 = vsel %vm926_vm2, 1.0, %v2789_v18 }
 0x17a   : > { %v1094_v5 = vmul.f32 0.6931472, %v1726_v45  ;;  %v1227_v63 = vsub.f32 %v1195_v44, %v2356_v11  ;;  %v1728_v29 = vpop.eup %1727  ;;  %vm1099_vm3 = vcmp.lt.f32.partialorder %v1098_v23, 0.0004427343  ;;  %v2498_v6 = vmul.f32 %v2493_v38, %v2334_v7 }
 0x17b   : > { %v1226_v13 = vsub.f32 %v1194_v59, %v2383_v43  ;;  %v1298_v26 = vadd.f32 %v2493_v38, %v1297_v56  ;;  %v1101_v14 = vadd.f32 1.0, %v1728_v29  ;;  %v2792_v11 = vmax.f32 %v2302_v10, 0.0 }
 0x17c   : > { %v1100_v0 = vsel %vm1099_vm3, %v1097_v24, %v1094_v5  ;;  %v1262_v16 = vmul.f32 %v2342_v15, %v1227_v63  ;;  %v1730_v55 = vpop.eup %1729  ;;  %vm928_vm4 = vcmp.gt.f32.partialorder %v2365_v31, 0.0  ;;  %v1104_v58 = vmul.f32 -0.5, %v1728_v29 }
 0x17d   : > { %v1196_v53 = vadd.f32 %v2792_v11, %v1100_v0  ;;  %v1242_v62 = vadd.f32 %v1241_v1, %v1226_v13  ;;  %v1261_v42 = vmul.f32 %v2374_v37, %v1226_v13  ;;  %1735 = vlog2.f32 %v1101_v14 }
 0x17e   : > { %v1119_v34 = vadd.f32 1.0, %v1730_v55  ;;  %v1181_v28 = vmax.f32 %v2325_v51, 0.0  ;;  %v1122_v15 = vmul.f32 -0.5, %v1730_v55  ;;  %v1183_v24 = vmax.f32 %v2332_v4, 0.0 }
 0x17f   : > { %v1276_v43 = vadd.f32 %v1275_v36, %v1261_v42  ;;  %v1228_v23 = vsub.f32 %v1196_v53, %v2392_v49  ;;  %v1243_v32 = vadd.f32 %v1242_v62, %v1227_v63  ;;  %v2513_v2 = vsel %vm928_vm4, 1.0, %v2789_v18 }
 0x180   : > { %1737 = vlog2.f32 %v1119_v34  ;;  %v1107_v31 = vand.u32 2147483647, %v1728_v29  ;;  %v1182_v20 = vmax.f32 %v2334_v7, 0.0  ;;  %v2518_v49 = vmul.f32 %v2513_v2, %v2344_v17 }
 0x181   : > { %v2509_v10 = vadd.f32 %v1243_v32, %v1228_v23  ;;  %v1263_v57 = vmul.f32 %v2377_v39, %v1228_v23  ;;  %v1277_v37 = vadd.f32 %v1276_v43, %v1262_v16  ;;  %v1299_v51 = vadd.f32 %v2482_v9, %v1298_v26 }
 0x182   : > { %v1732_v33 = vpop.eup %1731  ;;  %v1105_v4 = vadd.f32 1.0, %v1104_v58  ;;  %v977_v60 = vand.u32 2147483647, %v2414_v3  ;;  %v979_v39 = vand.u32 2147483647, %v2419_v35  ;;  %v1123_v27 = vadd.f32 1.0, %v1122_v15 }
 0x183   : > { %v2521_v50 = vadd.f32 %v1277_v37, %v1263_v57  ;;  %v2525_v1 = vpop.eup %1733  ;;  %v1125_v19 = vand.u32 2147483647, %v1730_v55  ;;  %v1110_v25 = vadd.f32 1.0, %v1732_v33  ;;  %v1300_v47 = vadd.f32 %v2513_v2, %v1299_v51 }
 0x184   : > { %v1113_v56 = vmul.f32 -0.5, %v1732_v33  ;;  %v1128_v52 = vadd.f32 1.0, %v2525_v1  ;;  %v1184_v44 = vmax.f32 %v2344_v17, 0.0  ;;  %v993_v30 = vsub.f32 0.0, %v977_v60 }
 0x185   : > { %1739 = vlog2.f32 %v1110_v25  ;;  %v1116_v36 = vand.u32 2147483647, %v1732_v33  ;;  %v1131_v45 = vmul.f32 -0.5, %v2525_v1  ;;  %v995_v12 = vsub.f32 0.0, %v979_v39 }
 0x186   : > { %v1106_v59 = vmul.f32 %v1728_v29, %v1105_v4  ;;  %vm2531_vm5 = vcmp.lt.f32.partialorder %v1107_v31, 0.0004427343  ;;  %1741 = vlog2.f32 %v1128_v52  ;;  %v1021_v63 = vmul.f32 1.442695, %v993_v30 }
 0x187   : > { %v1736_v13 = vpop.eup %1735  ;;  %v1124_v26 = vmul.f32 %v1730_v55, %v1123_v27  ;;  %vm2535_vm6 = vcmp.lt.f32.partialorder %v1125_v19, 0.0004427343  ;;  %v1025_v16 = vmul.f32 1.442695, %v995_v12  ;;  %v978_v14 = vand.u32 2147483647, %v2421_v40 }
 0x188   : > { %v1103_v11 = vmul.f32 0.6931472, %v1736_v13  ;;  %v1114_v53 = vadd.f32 1.0, %v1113_v56  ;;  %v1134_v62 = vand.u32 2147483647, %v2525_v1  ;;  %1743 = vpow2.f32 %v1021_v63 }
 0x189   : > { %vm2541_vm7 = vcmp.lt.f32.partialorder %v1116_v36, 0.0004427343  ;;  %v1132_v34 = vadd.f32 1.0, %v1131_v45  ;;  %1745 = vpow2.f32 %v1025_v16  ;;  %v994_v55 = vsub.f32 0.0, %v978_v14 }
 0x18a   : > { %v1738_v29 = vpop.eup %1737  ;;  %v980_v43 = vand.u32 2147483647, %v2429_v46  ;;  %v1109_v23 = vsel %vm2531_vm5, %v1106_v59, %v1103_v11  ;;  %vm929_vm8 = vcmp.gt.f32.partialorder %v2431_v48, 0.0  ;;  %vm931_vm9 = vcmp.gt.f32.partialorder %v2434_v61, 0.0 }
 0x18b   : > { %v1121_v32 = vmul.f32 0.6931472, %v1738_v29  ;;  %v1197_v58 = vadd.f32 %v1181_v28, %v1109_v23  ;;  %v1023_v15 = vmul.f32 1.442695, %v994_v55  ;;  %v2551_v37 = vsel %vm929_vm8, 1.0, %v2789_v18 }
 0x18c   : > { %v996_v57 = vsub.f32 0.0, %v980_v43  ;;  %v2557_v51 = vmul.f32 %v2551_v37, %v2414_v3  ;;  %v1301_v4 = vadd.f32 %v2551_v37, %v1300_v47  ;;  %v2561_v60 = vsel %vm931_vm9, 1.0, %v2789_v18 }
 0x18d   : > { %v1127_v31 = vsel %vm2535_vm6, %v1124_v26, %v1121_v32  ;;  %v1229_v61 = vsub.f32 %v1197_v58, %v2469_v41  ;;  %1747 = vpow2.f32 %v1023_v15  ;;  %v1115_v39 = vmul.f32 %v1732_v33, %v1114_v53 }
 0x18e   : > { %v1199_v48 = vadd.f32 %v1183_v24, %v1127_v31  ;;  %v1027_v28 = vmul.f32 1.442695, %v996_v57  ;;  %v2566_v27 = vmul.f32 %v2561_v60, %v2419_v35  ;;  %vm930_vm10 = vcmp.gt.f32.partialorder %v2436_v8, 0.0 }
 0x18f   : > { %vm932_vm11 = vcmp.gt.f32.partialorder %v2440_v21, 0.0  ;;  %v1740_v19 = vpop.eup %1739  ;;  %v1245_v25 = vadd.f32 %v2509_v10, %v1229_v61  ;;  %v1264_v47 = vmul.f32 %v2464_v54, %v1229_v61  ;;  %v1133_v33 = vmul.f32 %v2525_v1, %v1132_v34 }
 0x190   : > { %v1231_v24 = vsub.f32 %v1199_v48, %v2488_v22  ;;  %1749 = vpow2.f32 %v1027_v28  ;;  %v1742_v41 = vpop.eup %1741  ;;  %v1112_v56 = vmul.f32 0.6931472, %v1740_v19  ;;  %v2575_v52 = vsel %vm930_vm10, 1.0, %v2789_v18 }
 0x191   : > { %v2578_v30 = vsel %vm932_vm11, 1.0, %v2789_v18  ;;  %v1130_v8 = vmul.f32 0.6931472, %v1742_v41  ;;  %v1279_v21 = vadd.f32 %v2521_v50, %v1264_v47  ;;  %v2584_v54 = vmul.f32 %v2575_v52, %v2421_v40 }
 0x192   : > { %v1266_v10 = vmul.f32 %v2482_v9, %v1231_v24  ;;  %v1744_v22 = vpop.eup %1743  ;;  %v1118_v36 = vsel %vm2541_vm7, %v1115_v39, %v1112_v56  ;;  %vm1135_vm12 = vcmp.lt.f32.partialorder %v1134_v62, 0.0004427343  ;;  %v1302_v1 = vadd.f32 %v2575_v52, %v1301_v4 }
 0x193   : > { %v2591_v18 = vmul.f32 %v2578_v30, %v2429_v46  ;;  %v1746_v45 = vpop.eup %1745  ;;  %v1198_v50 = vadd.f32 %v1182_v20, %v1118_v36  ;;  %v1136_v9 = vsel %vm1135_vm12, %v1133_v33, %v1130_v8  ;;  %v1137_v12 = vadd.f32 1.0, %v1744_v22 }
 0x194   : > { %v1200_v59 = vadd.f32 %v1184_v44, %v1136_v9  ;;  %v1155_v5 = vadd.f32 1.0, %v1746_v45  ;;  %v1140_v20 = vmul.f32 -0.5, %v1744_v22  ;;  %v1158_v44 = vmul.f32 -0.5, %v1746_v45 }
 0x195   : > { %v1230_v63 = vsub.f32 %v1198_v50, %v2498_v6  ;;  %1751 = vlog2.f32 %v1137_v12  ;;  %v1303_v62 = vadd.f32 %v2561_v60, %v1302_v1  ;;  %v1143_v34 = vand.u32 2147483647, %v1744_v22 }
 0x196   : > { %v1232_v13 = vsub.f32 %v1200_v59, %v2518_v49  ;;  %1753 = vlog2.f32 %v1155_v5  ;;  %v1141_v42 = vadd.f32 1.0, %v1140_v20  ;;  %v1159_v55 = vadd.f32 1.0, %v1158_v44 }
 0x197   : > { %v1748_v26 = vpop.eup %1747  ;;  %v1246_v0 = vadd.f32 %v1245_v25, %v1230_v63  ;;  %v1265_v16 = vmul.f32 %v2493_v38, %v1230_v63  ;;  %v1304_v38 = vadd.f32 %v2578_v30, %v1303_v62  ;;  %v1161_v23 = vand.u32 2147483647, %v1746_v45 }
 0x198   : > { %v1267_v7 = vmul.f32 %v2513_v2, %v1232_v13  ;;  %v1146_v14 = vadd.f32 1.0, %v1748_v26  ;;  %v1149_v43 = vmul.f32 -0.5, %v1748_v26  ;;  %v1142_v31 = vmul.f32 %v1744_v22, %v1141_v42 }
 0x199   : > { %v1280_v53 = vadd.f32 %v1279_v21, %v1265_v16  ;;  %v1247_v17 = vadd.f32 %v1246_v0, %v1231_v24  ;;  %v1185_v4 = vmax.f32 %v2414_v3, 0.0  ;;  %v1187_v48 = vmax.f32 %v2419_v35, 0.0  ;;  %1306 = vst [vmem:[%s263_s24] sm:$0xff] %v1304_v38 }
 0x19a   : > { %v1750_v11 = vpop.eup %1749  ;;  %1755 = vlog2.f32 %v1146_v14  ;;  %vm1144_vm13 = vcmp.lt.f32.partialorder %v1143_v34, 0.0004427343  ;;  %v1160_v28 = vmul.f32 %v1746_v45, %v1159_v55  ;;  %v1150_v39 = vadd.f32 1.0, %v1149_v43 }
 0x19b   : > { %v1164_v6 = vadd.f32 1.0, %v1750_v11  ;;  %v1248_v49 = vadd.f32 %v1247_v17, %v1232_v13  ;;  %v1281_v29 = vadd.f32 %v1280_v53, %v1266_v10  ;;  %v1167_v32 = vmul.f32 -0.5, %v1750_v11 }
 0x19c   : > { %vm1162_vm14 = vcmp.lt.f32.partialorder %v1161_v23, 0.0004427343  ;;  %v1152_v25 = vand.u32 2147483647, %v1748_v26  ;;  %v1170_v8 = vand.u32 2147483647, %v1750_v11  ;;  %v1151_v3 = vmul.f32 %v1748_v26, %v1150_v39 }
 0x19d   : > { %1757 = vlog2.f32 %v1164_v6  ;;  %v1282_v2 = vadd.f32 %v1281_v29, %v1267_v7  ;;  %v1168_v47 = vadd.f32 1.0, %v1167_v32  ;;  %v1186_v22 = vmax.f32 %v2421_v40, 0.0 }
 0x19e   : > { %vm1153_vm15 = vcmp.lt.f32.partialorder %v1152_v25, 0.0004427343  ;;  %vm1171_vm0 = vcmp.lt.f32.partialorder %v1170_v8, 0.0004427343  ;;  %v1188_v5 = vmax.f32 %v2429_v46, 0.0 }
 0x19f   : > { %v1752_v58 = vpop.eup %1751  ;;  %v1169_v36 = vmul.f32 %v1750_v11, %v1168_v47 }
 0x1a0   : > { %v1754_v15 = vpop.eup %1753  ;;  %v1139_v57 = vmul.f32 0.6931472, %v1752_v58 }
 0x1a1   : > { %v1157_v61 = vmul.f32 0.6931472, %v1754_v15 }
 0x1a2   : > { %v1145_v19 = vsel %vm1144_vm13, %v1142_v31, %v1139_v57 }
 0x1a3   : > { %v1201_v24 = vadd.f32 %v1185_v4, %v1145_v19  ;;  %v1163_v41 = vsel %vm1162_vm14, %v1160_v28, %v1157_v61 }
 0x1a4   : > { %v1756_v56 = vpop.eup %1755  ;;  %v1203_v33 = vadd.f32 %v1187_v48, %v1163_v41 }
 0x1a5   : > { %v1148_v21 = vmul.f32 0.6931472, %v1756_v56  ;;  %v1233_v35 = vsub.f32 %v1201_v24, %v2557_v51 }
 0x1a6   : > { %v1235_v1 = vsub.f32 %v1203_v33, %v2566_v27 }
 0x1a7   : > { %v1758_v10 = vpop.eup %1757  ;;  %v1154_v45 = vsel %vm1153_vm15, %v1151_v3, %v1148_v21  ;;  %v1249_v9 = vadd.f32 %v1248_v49, %v1233_v35  ;;  %v1268_v12 = vmul.f32 %v2551_v37, %v1233_v35 }
 0x1a8   : > { %v1166_v50 = vmul.f32 0.6931472, %v1758_v10  ;;  %v1202_v59 = vadd.f32 %v1186_v22, %v1154_v45  ;;  %v1270_v51 = vmul.f32 %v2561_v60, %v1235_v1 }
 0x1a9   : > { %v1283_v40 = vadd.f32 %v1282_v2, %v1268_v12 }
 0x1aa   : > { %v1172_v63 = vsel %vm1171_vm0, %v1169_v36, %v1166_v50  ;;  %v1234_v27 = vsub.f32 %v1202_v59, %v2584_v54 }
 0x1ab   : > { %v1204_v13 = vadd.f32 %v1188_v5, %v1172_v63 }
 0x1ac   : > { %v1250_v26 = vadd.f32 %v1249_v9, %v1234_v27  ;;  %v1269_v0 = vmul.f32 %v2575_v52, %v1234_v27 }
 0x1ad   : > { %v1236_v37 = vsub.f32 %v1204_v13, %v2591_v18 }
 0x1ae   : > { %v1284_v16 = vadd.f32 %v1283_v40, %v1269_v0  ;;  %v1251_v7 = vadd.f32 %v1250_v26, %v1235_v1 }
 0x1af   : > { %v1271_v46 = vmul.f32 %v2578_v30, %v1236_v37 }
 0x1b0   : > { %v1252_v60 = vadd.f32 %v1251_v7, %v1236_v37  ;;  %v1285_v20 = vadd.f32 %v1284_v16, %v1270_v51 }
 0x1b2   : > { %v1286_v52 = vadd.f32 %v1285_v20, %v1271_v46  ;;  %1254 = vst [vmem:[%s249_s8] sm:$0xff] %v1252_v60 }
 0x1b3   : > { %1830 = shalt.err (!%p1827_p0)
}
 0x1b4   : > { %s1831_s11 = scalar_lea.hbm %s2632_s30, 128  ;;  %s1835_s8 = scalar_lea.hbm %s2749_s2, 256 }
 0x1b5   : > { %p1832_p2 = scmp.ne.s32.totalorder %s2632_s30, %s1831_s11  ;;  %p1836_p5 = scmp.lt.u32.totalorder %s2632_s30, %s2749_s2 }
 0x1b6   : > { %p1837_p9 = scmp.lt.u32.totalorder %s1835_s8, %s1831_s11  ;;  %p1839_p11 = scmp.lt.u32.totalorder %s1831_s11, %s2632_s30 }
 0x1b7   : > { %p1833_p7 = pnand %p1832_p2, %p2799_p13 }
 0x1b8   : > { %p1838_p10 = por %p1837_p9, %p1836_p5 }
 0x1b9   : > { %p1834_p12 = pneg %p1833_p7 }
 0x1ba   : > { %p1840_p4 = por %p1839_p11, %p1838_p10 }
 0x1bc   : > { %p1841_p1 = pnand %p1840_p4, %p1834_p12 }
 0x1be   : > { %1844 = shalt.err (!%p1841_p1)
}
 0x1bf   : > { %1611 = dma.vmem_to_hbm [thread:$0]  (%p2799_p13), %s2634_s10, 128, %s2632_s30, %s1308_s13  }
 0x1c0   : > { %s2800_s0 = scalar_lea.vmem [#allocation8], %s2603_s22  ;;  %s2801_s14 = sand.u32 1, %s2032_s21  }
 0x1c1   : > { %1288 = vst [vmem:[%s2800_s0] sm:$0xff] %v1286_v52  ;;  %s2676_s9 = scalar_lea.sflag [#allocation9], %s2801_s14  ;;  %s1845_s11 = scalar_lea.vmem %s2641_s12, 128 }
 0x1c2   : > { %p1846_p3 = scmp.ne.s32.totalorder %s2641_s12, %s1845_s11  ;;  %s1974_s27 = smov [#allocation8]  }
 0x1c3   : > { %s1849_s28 = sshll.u32 %s1974_s27, 4  ;;  %s1850_s28 = int_to_ptr.vmem [resolvable:$false] %s1849_s28 }
 0x1c4   : > { %p1847_p6 = pnand %p1846_p3, %p2799_p13  ;;  %s1851_s8 = scalar_lea.vmem %s1850_s28, 256 }
 0x1c5   : > { %p1852_p0 = scmp.lt.s32.totalorder %s2641_s12, %s1850_s28  ;;  %p1853_p2 = scmp.lt.s32.totalorder %s1851_s8, %s1845_s11 }
 0x1c6   : > { %p1848_p8 = pneg %p1847_p6 }
 0x1c7   : > { %p1854_p7 = por %p1853_p2, %p1852_p0 }
 0x1c9   : > { %p1855_p12 = pnand %p1854_p7, %p1848_p8 }
 0x1cb   : > { %1858 = shalt.err (!%p1855_p12)
}
 0x1cc   : > { %s1859_s21 = scalar_lea.hbm %s2639_s5, 128  ;;  %s1863_s30 = scalar_lea.hbm %s2750_s3, 256 }
 0x1cd   : > { %p1860_p5 = scmp.ne.s32.totalorder %s2639_s5, %s1859_s21  ;;  %p1864_p11 = scmp.lt.u32.totalorder %s2639_s5, %s2750_s3 }
 0x1ce   : > { %p1865_p4 = scmp.lt.u32.totalorder %s1863_s30, %s1859_s21  ;;  %p1867_p3 = scmp.lt.u32.totalorder %s1859_s21, %s2639_s5 }
 0x1cf   : > { %p1861_p9 = pnand %p1860_p5, %p2799_p13 }
 0x1d0   : > { %p1866_p1 = por %p1865_p4, %p1864_p11 }
 0x1d1   : > { %p1862_p10 = pneg %p1861_p9 }
 0x1d2   : > { %p1868_p6 = por %p1867_p3, %p1866_p1 }
 0x1d4   : > { %p1869_p8 = pnand %p1868_p6, %p1862_p10 }
 0x1d6   : > { %1872 = shalt.err (!%p1869_p8)
}
 0x1d7   : > { %1612 = dma.vmem_to_hbm [thread:$0]  (%p2799_p13), %s2641_s12, 128, %s2639_s5, %s2676_s9  }
 0x1d8   : > { %s1873_s18 = scalar_lea.vmem %s2648_s23, 128  ;;  %s1975_s0 = smov [#allocation10]  }
 0x1d9   : > { %p1874_p0 = scmp.ne.s32.totalorder %s2648_s23, %s1873_s18  ;;  %s1877_s14 = sshll.u32 %s1975_s0, 4  ;;  %s1878_s14 = int_to_ptr.vmem [resolvable:$false] %s1877_s14 }
 0x1da   : > { %s1879_s11 = scalar_lea.vmem %s1878_s14, 256  ;;  %p1880_p12 = scmp.lt.s32.totalorder %s2648_s23, %s1878_s14 }
 0x1db   : > { %p1875_p2 = pnand %p1874_p0, %p2799_p13  ;;  %p1881_p5 = scmp.lt.s32.totalorder %s1879_s11, %s1873_s18 }
 0x1dd   : > { %p1876_p7 = pneg %p1875_p2  ;;  %p1882_p9 = por %p1881_p5, %p1880_p12 }
 0x1df   : > { %p1883_p10 = pnand %p1882_p9, %p1876_p7 }
 0x1e1   : > { %1886 = shalt.err (!%p1883_p10)
}
 0x1e2   : > { %s1887_s12 = scalar_lea.hbm %s2646_s29, 128  ;;  %s1891_s28 = scalar_lea.hbm %s2751_s4, 256 }
 0x1e3   : > { %p1888_p11 = scmp.ne.s32.totalorder %s2646_s29, %s1887_s12  ;;  %p1892_p3 = scmp.lt.u32.totalorder %s2646_s29, %s2751_s4 }
 0x1e4   : > { %p1893_p6 = scmp.lt.u32.totalorder %s1891_s28, %s1887_s12  ;;  %p1895_p0 = scmp.lt.u32.totalorder %s1887_s12, %s2646_s29 }
 0x1e5   : > { %p1889_p4 = pnand %p1888_p11, %p2799_p13 }
 0x1e6   : > { %p1894_p8 = por %p1893_p6, %p1892_p3 }
 0x1e7   : > { %p1890_p1 = pneg %p1889_p4 }
 0x1e8   : > { %p1896_p2 = por %p1895_p0, %p1894_p8 }
 0x1ea   : > { %p1897_p7 = pnand %p1896_p2, %p1890_p1 }
 0x1ec   : > { %1900 = shalt.err (!%p1897_p7)
}
 0x1ed   : > { %1613 = dma.vmem_to_hbm [thread:$0]  (%p2799_p13), %s2648_s23, 128, %s2646_s29, %s2676_s9  }
 0x1ee PF: > { %s1369_s22 = sand.u32 1, %s1943_s15   ;;  %p2802_p12 = scmp.ne.s32.totalorder %s2766_s26, 0 }
 0x1ef   : > { %p2803_p5 = scmp.ge.s32.totalorder %s1963_s20, 2  ;;  %s1370_s10 = scalar_lea.sflag [#allocation4], %s1369_s22 }
 0x1f1   : > { %p1626_p9 = pnand %p2803_p5, %p2802_p12 }
 0x1f3   : > { %1934 = dma.done.wait (!%p1626_p9), %s1370_s10, 128  }
 0x1f4   : > { %1936 = vsyncadd (!%p1626_p9), %s1370_s10, 4294967168  ;;  %s2804_s30 = sadd.s32 4294967294, %s1963_s20  }
 0x1f5   : > { %s1378_s13 = sand.u32 1, %s2804_s30  }
 0x1f6   : > { %s1379_s24 = scalar_lea.sflag [#allocation9], %s1378_s13 }
 0x1f7   : > { %1938 = dma.done.wait (!%p1626_p9), %s1379_s24, 256  }
 0x1f8   : > { %1940 = vsyncadd (!%p1626_p9), %s1379_s24, 4294967040  ;;  %s25_s20 = sadd.s32 1, %s1963_s20   ;;  %s2805_s15 = smov %s1947_s16 }
 0x1f9   : > { %p22_p13 = scmp.ge.s32.totalorder %s25_s20, 4   ;;  %s2806_s16 = smov %s1951_s17 }
 0x1fa   : > { %s2807_s17 = smov %s2123_s7  ;;  %s2808_s18 = smov %s1959_s19 }
 0x1fb   : > { %s2809_s19 = smov %s2811_s6  ;;  %24 = sbr.rel (!%p22_p13) target bundleno = 11 (0xb), region = 114 }
 0x202   :  { %1393 = vsyncpa [#allocation3], 1 }
 0x203   :  { %1395 = vsyncpa [#allocation3 + $0x1], 1 }
 0x204   :  { %1396 = vsyncpa [#allocation6], 1 }
 0x205   :  { %1398 = vsyncpa [#allocation6 + $0x1], 1 }
 0x206   :  { %1399 = vsyncpa [#allocation4], 1 }
 0x207   :  { %1401 = vsyncpa [#allocation4 + $0x1], 1 }
 0x208   :  { %1402 = vsyncpa [#allocation9], 1 }
 0x209   :  { %1404 = vsyncpa [#allocation9 + $0x1], 1 }

</bundles_post_ra>
